<compile_context>
chip_gen: v7x
topology: tpu7x:2x2x1
jax: 0.10.0
libtpu: 0.0.40
codegen_flags: <defaults>
</compile_context>

<pallas_src>
import functools

import jax
import jax.numpy as jnp
from jax import lax
from jax.experimental import pallas as pl
from jax.experimental.pallas import tpu as pltpu

_EPS = 1e-8  # torch.nn.CosineSimilarity default eps


# ----------------------------------------------------------------------------
# Kernel 1: fused projection stacks (per-batch block), gated text average
# ----------------------------------------------------------------------------
def _proj_kernel(x_ref, mask_ref,
                 wcat_ref, bcat_ref,
                 w0e_ref, b0e_ref, woute_ref, boute_ref,
                 w0r_ref, b0r_ref, woutr_ref, boutr_ref,
                 ent_ref, rel_ref, avgx_ref):
    s_len = x_ref.shape[0]
    two_h = w0e_ref.shape[0]

    x_bf = x_ref[...]                                   # [S, E] bf16 (MXU operand)
    mask = mask_ref[...]                                # [S, 1] f32

    # one wide first-layer matmul for both branches: bf16 x bf16 -> f32 accumulate
    h = jnp.tanh(jnp.dot(x_bf, wcat_ref[...],
                         preferred_element_type=jnp.float32) + bcat_ref[...])   # [S, 4H]
    h_e = h[:, :two_h]                                  # entity half   [S, 2H]
    h_r = h[:, two_h:]                                  # relation half [S, 2H]

    # --- entity branch: masked features -> relu MLP -> per-token logit (VPU reduce) ---
    t_e = jnp.maximum(
        jnp.dot((h_e * mask).astype(jnp.bfloat16), w0e_ref[...],
                preferred_element_type=jnp.float32) + b0e_ref[...], 0.0)        # [S, H]
    ent_logits = (jnp.sum(t_e * woute_ref[...], axis=-1, keepdims=True)
                  + boute_ref[...])                                             # [S, 1]
    ent_ref[...] = ent_logits

    # --- relation branch: masked mean over S is an in-block sublane reduction ---
    msum = jnp.maximum(jnp.sum(mask, axis=0, keepdims=True), 1.0)               # [1, 1]
    pooled = jnp.sum(h_r * mask, axis=0, keepdims=True) / msum                  # [1, 2H]
    t_r = jnp.maximum(
        jnp.dot(pooled.astype(jnp.bfloat16), w0r_ref[...],
                preferred_element_type=jnp.float32) + b0r_ref[...], 0.0)        # [1, H]
    rel_ref[...] = (jnp.dot(t_r.astype(jnp.bfloat16), woutr_ref[...],
                            preferred_element_type=jnp.float32) + boutr_ref[...])  # [1, R]

    # --- entity-gated text average used by the linker: mean_S(x * sigmoid(ent)) ---
    gated = x_bf.astype(jnp.float32) * jax.nn.sigmoid(ent_logits)               # [S, E]
    avgx_ref[...] = jnp.sum(gated, axis=0, keepdims=True) * (1.0 / s_len)       # [1, E]


# ----------------------------------------------------------------------------
# Kernel 2: cosine similarities (candidate axis on lanes) + fused finalize
# ----------------------------------------------------------------------------
def _cos_finalize_kernel(avgx_ref, cand_ref, relavg_ref, hop_ref, hmask_ref, gw_ref,
                         linker_ref, gate_ref, cosl_sc, cosp_sc):
    c_tile = pl.program_id(1)
    tc = cand_ref.shape[-1]
    c_total = cosl_sc.shape[-1]
    eps2 = _EPS * _EPS

    a = avgx_ref[...]                                   # [E, 1] f32
    cand = cand_ref[...].astype(jnp.float32)            # [E, tc]
    r = relavg_ref[...]                                 # [G, 1] f32
    hop = hop_ref[...].astype(jnp.float32)              # [K, G, tc]
    hmask = hmask_ref[...]                              # [K, tc]

    # cosine(avg_x, cand label emb); torch semantics: clamp the norm *product* by eps
    dot_l = jnp.sum(cand * a, axis=0, keepdims=True)                   # [1, tc]
    ss_a = jnp.sum(a * a, axis=0, keepdims=True)                       # [1, 1]
    ss_c = jnp.sum(cand * cand, axis=0, keepdims=True)                 # [1, tc]
    cos_l = dot_l * lax.rsqrt(jnp.maximum(ss_a * ss_c, eps2))          # [1, tc]

    # cosine(1-hop relation embeddings, rel_avg) * mask, max-pooled over K
    dot_kb = jnp.sum(hop * r, axis=1)                                  # [K, tc]
    ss_h = jnp.sum(hop * hop, axis=1)                                  # [K, tc]
    ss_r = jnp.sum(r * r, axis=0, keepdims=True)                       # [1, 1]
    cos_kb = dot_kb * lax.rsqrt(jnp.maximum(ss_h * ss_r, eps2)) * hmask
    cos_p = jnp.max(cos_kb, axis=0, keepdims=True)                     # [1, tc]

    # stash this candidate tile in the resident [1, C] scratch rows
    if tc == c_total:                         # single tile: plain full-width store
        cosl_sc[...] = cos_l
        cosp_sc[...] = cos_p
    else:                                     # tc == 128: lane-aligned dynamic store
        off = pl.multiple_of(c_tile * tc, 128)
        cosl_sc[:, pl.ds(off, tc)] = cos_l
        cosp_sc[:, pl.ds(off, tc)] = cos_p

    # fused finalize on the last candidate tile: gate + sigmoid mix + log_softmax
    @pl.when(c_tile == pl.num_programs(1) - 1)
    def _():
        cl = cosl_sc[...]                                               # [1, C]
        cp = cosp_sc[...]                                               # [1, C]
        sa = jnp.sum(cl * gw_ref[...], axis=-1, keepdims=True)          # Linear(C->1)
        amb = jax.nn.sigmoid(sa)
        cos_cat = amb * (cl + cp) * 0.5 + (1.0 - amb) * cl
        cos_avg = jax.nn.sigmoid(cos_cat)
        m = jnp.max(cos_avg, axis=-1, keepdims=True)
        z = cos_avg - m
        lse = jnp.log(jnp.sum(jnp.exp(z), axis=-1, keepdims=True))
        linker_ref[...] = z - lse
        gate_ref[...] = sa


# ----------------------------------------------------------------------------
# Forward wrapper (plain-JAX glue: gathers, layout, gumbel sampling)
# ----------------------------------------------------------------------------
def e2e_entity_linker_forward(params, inputs, gumbel_key):
    text = inputs["text"]          # [S, B] int32
    t_mask = inputs["t_mask"]      # [S, B] f32
    S, B = text.shape
    E = params["embed_w"].shape[1]
    H = params["W0_e"].shape[1]
    R = params["Wout_r"].shape[1]
    G = params["kg_rel_w"].shape[1]

    # batch-major embedding lookup + mask, feature axes on lanes
    x_bse = params["embed_w"][text].transpose(1, 0, 2)                  # bf16 [B, S, E]
    mask3 = t_mask.T.reshape(B, S, 1)                                   # f32  [B, S, 1]

    # bf16 weights for the MXU (f32 master copies stay in params for l2_soft_loss)
    wcat = jnp.concatenate([params["W_in_e"], params["W_in_r"]], axis=1).astype(jnp.bfloat16)
    bcat = jnp.concatenate([params["b_in_e"], params["b_in_r"]]).reshape(1, -1)
    w0e = params["W0_e"].astype(jnp.bfloat16)
    w0r = params["W0_r"].astype(jnp.bfloat16)
    woutr = params["Wout_r"].astype(jnp.bfloat16)
    woute_row = params["Wout_e"].reshape(1, H)                          # f32 row (VPU)

    ent_col, rel3, avgx3 = pl.pallas_call(
        _proj_kernel,
        out_shape=(jax.ShapeDtypeStruct((B, S, 1), jnp.float32),
                   jax.ShapeDtypeStruct((B, 1, R), jnp.float32),
                   jax.ShapeDtypeStruct((B, 1, E), jnp.float32)),
        grid=(B,),
        in_specs=[
            pl.BlockSpec((None, S, E), lambda i: (i, 0, 0)),
            pl.BlockSpec((None, S, 1), lambda i: (i, 0, 0)),
            pl.BlockSpec(wcat.shape, lambda i: (0, 0)),
            pl.BlockSpec(bcat.shape, lambda i: (0, 0)),
            pl.BlockSpec(w0e.shape, lambda i: (0, 0)),
            pl.BlockSpec((1, H), lambda i: (0, 0)),
            pl.BlockSpec((1, H), lambda i: (0, 0)),
            pl.BlockSpec((1, 1), lambda i: (0, 0)),
            pl.BlockSpec(w0r.shape, lambda i: (0, 0)),
            pl.BlockSpec((1, H), lambda i: (0, 0)),
            pl.BlockSpec(woutr.shape, lambda i: (0, 0)),
            pl.BlockSpec((1, R), lambda i: (0, 0)),
        ],
        out_specs=(pl.BlockSpec((None, S, 1), lambda i: (i, 0, 0)),
                   pl.BlockSpec((None, 1, R), lambda i: (i, 0, 0)),
                   pl.BlockSpec((None, 1, E), lambda i: (i, 0, 0))),
        compiler_params=pltpu.CompilerParams(dimension_semantics=("parallel",)),
    )(x_bse, mask3,
      wcat, bcat,
      w0e, params["b0_e"].reshape(1, -1), woute_row, params["bout_e"].reshape(1, 1),
      w0r, params["b0_r"].reshape(1, -1), woutr, params["bout_r"].reshape(1, -1))

    # ent_pred_out in (s, b) row order, matching the batch_first=False reference
    ent_pred_out = ent_col[:, :, 0].T.reshape(S * B, 1)
    rel_out = rel3[:, 0, :]                                             # [B, R]
    avg_x_col = avgx3.reshape(B, E, 1)                                  # E on sublanes

    # Gumbel hard sample == one_hot(argmax(logits + g)) -> single row gather
    u = jax.random.uniform(gumbel_key, rel_out.shape)
    g = -jnp.log(-jnp.log(u + 1e-20) + 1e-20)
    rel_idx = jnp.argmax(rel_out + g, axis=-1)                          # [B]
    rel_avg_col = params["kg_rel_w"][rel_idx].astype(jnp.float32).reshape(B, G, 1)

    # candidate / 1-hop embedding gathers, candidate axis moved to lanes (minor dim = C)
    cand_mean = jnp.mean(params["embed_w"][inputs["cand_labels"]].astype(jnp.float32),
                         axis=2)                                         # [B, C, E]
    cand_t = cand_mean.astype(jnp.bfloat16).transpose(0, 2, 1)           # [B, E, C]
    hop_t = params["kg_rel_w"][inputs["reln_1hop"]].transpose(0, 2, 3, 1)  # [B, K, G, C]
    hmask_t = inputs["reln_1hop_mask"].transpose(0, 2, 1)                # [B, K, C]

    C = cand_t.shape[2]
    K = hop_t.shape[1]
    tc = C if C <= 128 else 128
    assert C % tc == 0, "pad the candidate axis to a multiple of 128"

    linker3, gate3 = pl.pallas_call(
        _cos_finalize_kernel,
        out_shape=(jax.ShapeDtypeStruct((B, 1, C), jnp.float32),
                   jax.ShapeDtypeStruct((B, 1, 1), jnp.float32)),
        grid=(B, C // tc),
        in_specs=[
            pl.BlockSpec((None, E, 1), lambda b, c: (b, 0, 0)),
            pl.BlockSpec((None, E, tc), lambda b, c: (b, 0, c)),
            pl.BlockSpec((None, G, 1), lambda b, c: (b, 0, 0)),
            pl.BlockSpec((None, K, G, tc), lambda b, c: (b, 0, 0, c)),
            pl.BlockSpec((None, K, tc), lambda b, c: (b, 0, c)),
            pl.BlockSpec((1, C), lambda b, c: (0, 0)),
        ],
        out_specs=(pl.BlockSpec((None, 1, C), lambda b, c: (b, 0, 0)),
                   pl.BlockSpec((None, 1, 1), lambda b, c: (b, 0, 0))),
        scratch_shapes=[pltpu.VMEM((1, C), jnp.float32),
                        pltpu.VMEM((1, C), jnp.float32)],
        compiler_params=pltpu.CompilerParams(
            dimension_semantics=("parallel", "arbitrary")),
    )(avg_x_col, cand_t, rel_avg_col, hop_t, hmask_t, params["soft_gate_w"])

    ent_linker = linker3[:, 0, :]                                       # [B, C]
    sa_gate = gate3[:, 0, :]                                            # [B, 1]

    # l2_soft_loss = ||W0_e - W0_r||^2 (weight-only scalar; exact f32 master weights)
    l2_loss = jnp.sum((params["W0_e"] - params["W0_r"]) ** 2)

    return ent_pred_out, rel_out, ent_linker, sa_gate, l2_loss


# ----------------------------------------------------------------------------
# Deterministic parameter construction
# ----------------------------------------------------------------------------
def make_params(key, num_words, E, G, H, C, R):
    ks = jax.random.split(key, 16)
    s = 0.1
    embed_w = s * jax.random.normal(ks[0], (num_words, E), jnp.float32)
    embed_w = embed_w.at[0].set(0.0).astype(jnp.bfloat16)      # padding_idx=0, bf16 table
    kg_rel_w = s * jax.random.normal(ks[1], (R, G), jnp.float32)
    kg_rel_w = kg_rel_w.at[0].set(0.0).astype(jnp.bfloat16)    # padding_idx=0, bf16 table
    return dict(
        embed_w=embed_w,
        kg_rel_w=kg_rel_w,
        # EntityDetection (simplified stand-in)
        W_in_e=s * jax.random.normal(ks[2], (E, 2 * H), jnp.float32),
        b_in_e=jnp.zeros((2 * H,), jnp.float32),
        W0_e=s * jax.random.normal(ks[3], (2 * H, H), jnp.float32),
        b0_e=jnp.zeros((H,), jnp.float32),
        Wout_e=s * jax.random.normal(ks[4], (H, 1), jnp.float32),
        bout_e=jnp.zeros((1,), jnp.float32),
        # RelationPrediction (simplified stand-in)
        W_in_r=s * jax.random.normal(ks[5], (E, 2 * H), jnp.float32),
        b_in_r=jnp.zeros((2 * H,), jnp.float32),
        W0_r=s * jax.random.normal(ks[6], (2 * H, H), jnp.float32),
        b0_r=jnp.zeros((H,), jnp.float32),
        Wout_r=s * jax.random.normal(ks[7], (H, R), jnp.float32),
        bout_r=jnp.zeros((R,), jnp.float32),
        # soft_gate: Linear(ent_cand_size -> 1, bias=False)
        soft_gate_w=s * jax.random.normal(ks[8], (1, C), jnp.float32),
    )


if __name__ == "__main__":
    # small shapes consistent with the module
    S, B = 8, 2            # seq, batch
    E, G, H = 32, 16, 32   # word emb, kg emb, hidden
    C, R = 8, 16           # ent_cand_size, rel_size (stands in for 6701)
    L, K = 4, 4            # words per candidate label, 1-hop relations per candidate
    num_words = 100

    key = jax.random.PRNGKey(0)
    kp, kt, kc, kh, km, kg = jax.random.split(key, 6)

    params = make_params(kp, num_words, E, G, H, C, R)

    inputs = dict(
        text=jax.random.randint(kt, (S, B), 1, num_words, dtype=jnp.int32),
        t_mask=jnp.ones((S, B), jnp.float32),
        cand_labels=jax.random.randint(kc, (B, C, L), 1, num_words, dtype=jnp.int32),
        reln_1hop=jax.random.randint(kh, (B, C, K), 0, R, dtype=jnp.int32),
        reln_1hop_mask=(jax.random.uniform(km, (B, C, K)) > 0.3).astype(jnp.float32),
        # all_reln (= arange(rel_size)) is an identity gather in the original module; the
        # rel_avg row gather above is its exact forward equivalent.
    )

    fwd = jax.jit(e2e_entity_linker_forward)
    ent_pred_out, rel_out, ent_linker, sa_gate, l2_loss = fwd(params, inputs, kg)
    jax.block_until_ready((ent_pred_out, rel_out, ent_linker, sa_gate, l2_loss))

    assert ent_pred_out.shape == (S * B, 1)
    assert rel_out.shape == (B, R)
    assert ent_linker.shape == (B, C)
    assert sa_gate.shape == (B, 1)
    assert l2_loss.shape == ()
    print("KERNEL_OK")
</pallas_src>

<mosaic_0001>
module attributes {stable_mosaic.version = 11 : i64} {
  func.func @_proj_kernel(%arg0: i32, %arg1: memref<1x8x32xbf16, #tpu.memory_space<vmem>>, %arg2: memref<1x8x1xf32, #tpu.memory_space<vmem>>, %arg3: memref<32x128xbf16, #tpu.memory_space<vmem>>, %arg4: memref<1x128xf32, #tpu.memory_space<vmem>>, %arg5: memref<64x32xbf16, #tpu.memory_space<vmem>>, %arg6: memref<1x32xf32, #tpu.memory_space<vmem>>, %arg7: memref<1x32xf32, #tpu.memory_space<vmem>>, %arg8: memref<1x1xf32, #tpu.memory_space<vmem>>, %arg9: memref<64x32xbf16, #tpu.memory_space<vmem>>, %arg10: memref<1x32xf32, #tpu.memory_space<vmem>>, %arg11: memref<32x16xbf16, #tpu.memory_space<vmem>>, %arg12: memref<1x16xf32, #tpu.memory_space<vmem>>, %arg13: memref<1x8x1xf32, #tpu.memory_space<vmem>>, %arg14: memref<1x1x16xf32, #tpu.memory_space<vmem>>, %arg15: memref<1x1x32xf32, #tpu.memory_space<vmem>>) attributes {dimension_semantics = [#tpu.dimension_semantics<parallel>], iteration_bounds = array<i64: 2>, scalar_prefetch = 0 : i64, scratch_operands = 0 : i64, tpu.core_type = #tpu.core_type<tc>, window_params = [{transform_indices = @transform_0, window_bounds = array<i64: 1, 8, 32>}, {transform_indices = @transform_1, window_bounds = array<i64: 1, 8, 1>}, {pipeline_mode = #tpu.pipeline_mode<synchronous>, transform_indices = @transform_2, window_bounds = array<i64: 32, 128>}, {pipeline_mode = #tpu.pipeline_mode<synchronous>, transform_indices = @transform_3, window_bounds = array<i64: 1, 128>}, {pipeline_mode = #tpu.pipeline_mode<synchronous>, transform_indices = @transform_4, window_bounds = array<i64: 64, 32>}, {pipeline_mode = #tpu.pipeline_mode<synchronous>, transform_indices = @transform_5, window_bounds = array<i64: 1, 32>}, {pipeline_mode = #tpu.pipeline_mode<synchronous>, transform_indices = @transform_6, window_bounds = array<i64: 1, 32>}, {pipeline_mode = #tpu.pipeline_mode<synchronous>, transform_indices = @transform_7, window_bounds = array<i64: 1, 1>}, {pipeline_mode = #tpu.pipeline_mode<synchronous>, transform_indices = @transform_8, window_bounds = array<i64: 64, 32>}, {pipeline_mode = #tpu.pipeline_mode<synchronous>, transform_indices = @transform_9, window_bounds = array<i64: 1, 32>}, {pipeline_mode = #tpu.pipeline_mode<synchronous>, transform_indices = @transform_10, window_bounds = array<i64: 32, 16>}, {pipeline_mode = #tpu.pipeline_mode<synchronous>, transform_indices = @transform_11, window_bounds = array<i64: 1, 16>}, {transform_indices = @transform_12, window_bounds = array<i64: 1, 8, 1>}, {transform_indices = @transform_13, window_bounds = array<i64: 1, 1, 16>}, {transform_indices = @transform_14, window_bounds = array<i64: 1, 1, 32>}]} {
    %c0 = arith.constant 0 : index
    %c0_0 = arith.constant 0 : index
    %c0_1 = arith.constant 0 : index
    %0 = vector.load %arg1[%c0, %c0_0, %c0_1] : memref<1x8x32xbf16, #tpu.memory_space<vmem>>, vector<1x8x32xbf16>
    %1 = vector.shape_cast %0 : vector<1x8x32xbf16> to vector<8x32xbf16>
    %c0_2 = arith.constant 0 : index
    %c0_3 = arith.constant 0 : index
    %c0_4 = arith.constant 0 : index
    %2 = vector.load %arg2[%c0_2, %c0_3, %c0_4] : memref<1x8x1xf32, #tpu.memory_space<vmem>>, vector<1x8x1xf32>
    %3 = vector.shape_cast %2 : vector<1x8x1xf32> to vector<8x1xf32>
    %c0_5 = arith.constant 0 : index
    %c0_6 = arith.constant 0 : index
    %4 = vector.load %arg3[%c0_5, %c0_6] : memref<32x128xbf16, #tpu.memory_space<vmem>>, vector<32x128xbf16>
    %cst = arith.constant dense<0.000000e+00> : vector<8x128xf32>
    %5 = tpu.matmul %1, %4, %cst {dimension_numbers = #tpu.dot_dimension_numbers<[1], [0], [0], [1], [0, 0, 1, 1], [], []>} : vector<8x32xbf16>, vector<32x128xbf16>, vector<8x128xf32> -> vector<8x128xf32>
    %c0_7 = arith.constant 0 : index
    %c0_8 = arith.constant 0 : index
    %6 = vector.load %arg4[%c0_7, %c0_8] : memref<1x128xf32, #tpu.memory_space<vmem>>, vector<1x128xf32>
    %7 = vector.broadcast %6 : vector<1x128xf32> to vector<8x128xf32>
    %8 = arith.addf %5, %7 : vector<8x128xf32>
    %9 = math.tanh %8 : vector<8x128xf32>
    %10 = vector.extract_strided_slice %9 {offsets = [0, 0], sizes = [8, 64], strides = [1, 1]} : vector<8x128xf32> to vector<8x64xf32>
    %11 = vector.extract_strided_slice %9 {offsets = [0, 64], sizes = [8, 64], strides = [1, 1]} : vector<8x128xf32> to vector<8x64xf32>
    %12 = vector.broadcast %3 : vector<8x1xf32> to vector<8x64xf32>
    %13 = arith.mulf %10, %12 : vector<8x64xf32>
    %14 = arith.truncf %13 : vector<8x64xf32> to vector<8x64xbf16>
    %c0_9 = arith.constant 0 : index
    %c0_10 = arith.constant 0 : index
    %15 = vector.load %arg5[%c0_9, %c0_10] : memref<64x32xbf16, #tpu.memory_space<vmem>>, vector<64x32xbf16>
    %cst_11 = arith.constant dense<0.000000e+00> : vector<8x32xf32>
    %16 = tpu.matmul %14, %15, %cst_11 {dimension_numbers = #tpu.dot_dimension_numbers<[1], [0], [0], [1], [0, 0, 1, 1], [], []>} : vector<8x64xbf16>, vector<64x32xbf16>, vector<8x32xf32> -> vector<8x32xf32>
    %c0_12 = arith.constant 0 : index
    %c0_13 = arith.constant 0 : index
    %17 = vector.load %arg6[%c0_12, %c0_13] : memref<1x32xf32, #tpu.memory_space<vmem>>, vector<1x32xf32>
    %18 = vector.broadcast %17 : vector<1x32xf32> to vector<8x32xf32>
    %19 = arith.addf %16, %18 : vector<8x32xf32>
    %cst_14 = arith.constant 0.000000e+00 : f32
    %20 = vector.broadcast %cst_14 : f32 to vector<8x32xf32>
    %21 = arith.maximumf %19, %20 : vector<8x32xf32>
    %c0_15 = arith.constant 0 : index
    %c0_16 = arith.constant 0 : index
    %22 = vector.load %arg7[%c0_15, %c0_16] : memref<1x32xf32, #tpu.memory_space<vmem>>, vector<1x32xf32>
    %23 = vector.broadcast %22 : vector<1x32xf32> to vector<8x32xf32>
    %24 = arith.mulf %21, %23 : vector<8x32xf32>
    %cst_17 = arith.constant dense<0.000000e+00> : vector<8xf32>
    %25 = vector.multi_reduction <add>, %24, %cst_17 [1] : vector<8x32xf32> to vector<8xf32>
    %26 = vector.shape_cast %25 : vector<8xf32> to vector<8x1xf32>
    %c0_18 = arith.constant 0 : index
    %c0_19 = arith.constant 0 : index
    %27 = vector.load %arg8[%c0_18, %c0_19] : memref<1x1xf32, #tpu.memory_space<vmem>>, vector<1x1xf32>
    %28 = vector.broadcast %27 : vector<1x1xf32> to vector<8x1xf32>
    %29 = arith.addf %26, %28 : vector<8x1xf32>
    %c0_20 = arith.constant 0 : index
    %c0_21 = arith.constant 0 : index
    %c0_22 = arith.constant 0 : index
    %30 = vector.load %arg13[%c0_20, %c0_21, %c0_22] : memref<1x8x1xf32, #tpu.memory_space<vmem>>, vector<1x8x1xf32>
    %31 = vector.shape_cast %30 : vector<1x8x1xf32> to vector<8x1xf32>
    %32 = vector.shape_cast %29 : vector<8x1xf32> to vector<1x8x1xf32>
    tpu.vector_store %arg13[%c0_20, %c0_21, %c0_22], %32 {strides = array<i32>} : memref<1x8x1xf32, #tpu.memory_space<vmem>>, vector<1x8x1xf32>,
    %cst_23 = arith.constant dense<0.000000e+00> : vector<1xf32>
    %33 = vector.multi_reduction <add>, %3, %cst_23 [0] : vector<8x1xf32> to vector<1xf32>
    %34 = vector.shape_cast %33 : vector<1xf32> to vector<1x1xf32>
    %cst_24 = arith.constant 1.000000e+00 : f32
    %35 = vector.broadcast %cst_24 : f32 to vector<1x1xf32>
    %36 = arith.maximumf %34, %35 : vector<1x1xf32>
    %37 = vector.broadcast %3 : vector<8x1xf32> to vector<8x64xf32>
    %38 = arith.mulf %11, %37 : vector<8x64xf32>
    %cst_25 = arith.constant dense<0.000000e+00> : vector<64xf32>
    %39 = vector.multi_reduction <add>, %38, %cst_25 [0] : vector<8x64xf32> to vector<64xf32>
    %40 = vector.shape_cast %39 : vector<64xf32> to vector<1x64xf32>
    %41 = vector.broadcast %36 : vector<1x1xf32> to vector<1x64xf32>
    %42 = arith.divf %40, %41 : vector<1x64xf32>
    %43 = arith.truncf %42 : vector<1x64xf32> to vector<1x64xbf16>
    %c0_26 = arith.constant 0 : index
    %c0_27 = arith.constant 0 : index
    %44 = vector.load %arg9[%c0_26, %c0_27] : memref<64x32xbf16, #tpu.memory_space<vmem>>, vector<64x32xbf16>
    %cst_28 = arith.constant dense<0.000000e+00> : vector<1x32xf32>
    %45 = tpu.matmul %43, %44, %cst_28 {dimension_numbers = #tpu.dot_dimension_numbers<[1], [0], [0], [1], [0, 0, 1, 1], [], []>} : vector<1x64xbf16>, vector<64x32xbf16>, vector<1x32xf32> -> vector<1x32xf32>
    %c0_29 = arith.constant 0 : index
    %c0_30 = arith.constant 0 : index
    %46 = vector.load %arg10[%c0_29, %c0_30] : memref<1x32xf32, #tpu.memory_space<vmem>>, vector<1x32xf32>
    %47 = arith.addf %45, %46 : vector<1x32xf32>
    %cst_31 = arith.constant 0.000000e+00 : f32
    %48 = vector.broadcast %cst_31 : f32 to vector<1x32xf32>
    %49 = arith.maximumf %47, %48 : vector<1x32xf32>
    %50 = arith.truncf %49 : vector<1x32xf32> to vector<1x32xbf16>
    %c0_32 = arith.constant 0 : index
    %c0_33 = arith.constant 0 : index
    %51 = vector.load %arg11[%c0_32, %c0_33] : memref<32x16xbf16, #tpu.memory_space<vmem>>, vector<32x16xbf16>
    %cst_34 = arith.constant dense<0.000000e+00> : vector<1x16xf32>
    %52 = tpu.matmul %50, %51, %cst_34 {dimension_numbers = #tpu.dot_dimension_numbers<[1], [0], [0], [1], [0, 0, 1, 1], [], []>} : vector<1x32xbf16>, vector<32x16xbf16>, vector<1x16xf32> -> vector<1x16xf32>
    %c0_35 = arith.constant 0 : index
    %c0_36 = arith.constant 0 : index
    %53 = vector.load %arg12[%c0_35, %c0_36] : memref<1x16xf32, #tpu.memory_space<vmem>>, vector<1x16xf32>
    %54 = arith.addf %52, %53 : vector<1x16xf32>
    %c0_37 = arith.constant 0 : index
    %c0_38 = arith.constant 0 : index
    %c0_39 = arith.constant 0 : index
    %55 = vector.load %arg14[%c0_37, %c0_38, %c0_39] : memref<1x1x16xf32, #tpu.memory_space<vmem>>, vector<1x1x16xf32>
    %56 = vector.shape_cast %55 : vector<1x1x16xf32> to vector<1x16xf32>
    %57 = vector.shape_cast %54 : vector<1x16xf32> to vector<1x1x16xf32>
    tpu.vector_store %arg14[%c0_37, %c0_38, %c0_39], %57 {strides = array<i32>} : memref<1x1x16xf32, #tpu.memory_space<vmem>>, vector<1x1x16xf32>,
    %58 = arith.extf %1 : vector<8x32xbf16> to vector<8x32xf32>
    %59 = arith.negf %29 : vector<8x1xf32>
    %60 = math.exp %59 : vector<8x1xf32>
    %cst_40 = arith.constant 1.000000e+00 : f32
    %61 = vector.broadcast %cst_40 : f32 to vector<8x1xf32>
    %62 = arith.addf %61, %60 : vector<8x1xf32>
    %63 = arith.divf %61, %62 : vector<8x1xf32>
    %64 = vector.broadcast %63 : vector<8x1xf32> to vector<8x32xf32>
    %65 = arith.mulf %58, %64 : vector<8x32xf32>
    %cst_41 = arith.constant dense<0.000000e+00> : vector<32xf32>
    %66 = vector.multi_reduction <add>, %65, %cst_41 [0] : vector<8x32xf32> to vector<32xf32>
    %67 = vector.shape_cast %66 : vector<32xf32> to vector<1x32xf32>
    %cst_42 = arith.constant 1.250000e-01 : f32
    %68 = vector.broadcast %cst_42 : f32 to vector<1x32xf32>
    %69 = arith.mulf %67, %68 : vector<1x32xf32>
    %c0_43 = arith.constant 0 : index
    %c0_44 = arith.constant 0 : index
    %c0_45 = arith.constant 0 : index
    %70 = vector.load %arg15[%c0_43, %c0_44, %c0_45] : memref<1x1x32xf32, #tpu.memory_space<vmem>>, vector<1x1x32xf32>
    %71 = vector.shape_cast %70 : vector<1x1x32xf32> to vector<1x32xf32>
    %72 = vector.shape_cast %69 : vector<1x32xf32> to vector<1x1x32xf32>
    tpu.vector_store %arg15[%c0_43, %c0_44, %c0_45], %72 {strides = array<i32>} : memref<1x1x32xf32, #tpu.memory_space<vmem>>, vector<1x1x32xf32>,
    return
  }
  func.func @transform_0(%arg0: i32) -> (i32, i32, i32) {
    %c0_i32 = arith.constant 0 : i32
    %c0_i32_0 = arith.constant 0 : i32
    %c0_i32_1 = arith.constant 0 : i32
    return %arg0, %c0_i32, %c0_i32_0 : i32, i32, i32
  }
  func.func @transform_1(%arg0: i32) -> (i32, i32, i32) {
    %c0_i32 = arith.constant 0 : i32
    %c0_i32_0 = arith.constant 0 : i32
    %c0_i32_1 = arith.constant 0 : i32
    return %arg0, %c0_i32, %c0_i32_0 : i32, i32, i32
  }
  func.func @transform_2(%arg0: i32) -> (i32, i32) {
    %c0_i32 = arith.constant 0 : i32
    %c0_i32_0 = arith.constant 0 : i32
    %c0_i32_1 = arith.constant 0 : i32
    return %c0_i32, %c0_i32_0 : i32, i32
  }
  func.func @transform_3(%arg0: i32) -> (i32, i32) {
    %c0_i32 = arith.constant 0 : i32
    %c0_i32_0 = arith.constant 0 : i32
    %c0_i32_1 = arith.constant 0 : i32
    return %c0_i32, %c0_i32_0 : i32, i32
  }
  func.func @transform_4(%arg0: i32) -> (i32, i32) {
    %c0_i32 = arith.constant 0 : i32
    %c0_i32_0 = arith.constant 0 : i32
    %c0_i32_1 = arith.constant 0 : i32
    return %c0_i32, %c0_i32_0 : i32, i32
  }
  func.func @transform_5(%arg0: i32) -> (i32, i32) {
    %c0_i32 = arith.constant 0 : i32
    %c0_i32_0 = arith.constant 0 : i32
    %c0_i32_1 = arith.constant 0 : i32
    return %c0_i32, %c0_i32_0 : i32, i32
  }
  func.func @transform_6(%arg0: i32) -> (i32, i32) {
    %c0_i32 = arith.constant 0 : i32
    %c0_i32_0 = arith.constant 0 : i32
    %c0_i32_1 = arith.constant 0 : i32
    return %c0_i32, %c0_i32_0 : i32, i32
  }
  func.func @transform_7(%arg0: i32) -> (i32, i32) {
    %c0_i32 = arith.constant 0 : i32
    %c0_i32_0 = arith.constant 0 : i32
    %c0_i32_1 = arith.constant 0 : i32
    return %c0_i32, %c0_i32_0 : i32, i32
  }
  func.func @transform_8(%arg0: i32) -> (i32, i32) {
    %c0_i32 = arith.constant 0 : i32
    %c0_i32_0 = arith.constant 0 : i32
    %c0_i32_1 = arith.constant 0 : i32
    return %c0_i32, %c0_i32_0 : i32, i32
  }
  func.func @transform_9(%arg0: i32) -> (i32, i32) {
    %c0_i32 = arith.constant 0 : i32
    %c0_i32_0 = arith.constant 0 : i32
    %c0_i32_1 = arith.constant 0 : i32
    return %c0_i32, %c0_i32_0 : i32, i32
  }
  func.func @transform_10(%arg0: i32) -> (i32, i32) {
    %c0_i32 = arith.constant 0 : i32
    %c0_i32_0 = arith.constant 0 : i32
    %c0_i32_1 = arith.constant 0 : i32
    return %c0_i32, %c0_i32_0 : i32, i32
  }
  func.func @transform_11(%arg0: i32) -> (i32, i32) {
    %c0_i32 = arith.constant 0 : i32
    %c0_i32_0 = arith.constant 0 : i32
    %c0_i32_1 = arith.constant 0 : i32
    return %c0_i32, %c0_i32_0 : i32, i32
  }
  func.func @transform_12(%arg0: i32) -> (i32, i32, i32) {
    %c0_i32 = arith.constant 0 : i32
    %c0_i32_0 = arith.constant 0 : i32
    %c0_i32_1 = arith.constant 0 : i32
    return %arg0, %c0_i32, %c0_i32_0 : i32, i32, i32
  }
  func.func @transform_13(%arg0: i32) -> (i32, i32, i32) {
    %c0_i32 = arith.constant 0 : i32
    %c0_i32_0 = arith.constant 0 : i32
    %c0_i32_1 = arith.constant 0 : i32
    return %arg0, %c0_i32, %c0_i32_0 : i32, i32, i32
  }
  func.func @transform_14(%arg0: i32) -> (i32, i32, i32) {
    %c0_i32 = arith.constant 0 : i32
    %c0_i32_0 = arith.constant 0 : i32
    %c0_i32_1 = arith.constant 0 : i32
    return %arg0, %c0_i32, %c0_i32_0 : i32, i32, i32
  }
}

module attributes {stable_mosaic.version = 11 : i64} {
  func.func @_cos_finalize_kernel(%arg0: i32, %arg1: i32, %arg2: memref<1x32x1xf32, #tpu.memory_space<vmem>>, %arg3: memref<1x32x8xbf16, #tpu.memory_space<vmem>>, %arg4: memref<1x16x1xf32, #tpu.memory_space<vmem>>, %arg5: memref<1x4x16x8xbf16, #tpu.memory_space<vmem>>, %arg6: memref<1x4x8xf32, #tpu.memory_space<vmem>>, %arg7: memref<1x8xf32, #tpu.memory_space<vmem>>, %arg8: memref<1x1x8xf32, #tpu.memory_space<vmem>>, %arg9: memref<1x1x1xf32, #tpu.memory_space<vmem>>, %arg10: memref<1x8xf32, #tpu.memory_space<vmem>>, %arg11: memref<1x8xf32, #tpu.memory_space<vmem>>) attributes {dimension_semantics = [#tpu.dimension_semantics<parallel>, #tpu.dimension_semantics<arbitrary>], iteration_bounds = array<i64: 2, 1>, scalar_prefetch = 0 : i64, scratch_operands = 2 : i64, tpu.core_type = #tpu.core_type<tc>, window_params = [{transform_indices = @transform_0, window_bounds = array<i64: 1, 32, 1>}, {transform_indices = @transform_1, window_bounds = array<i64: 1, 32, 8>}, {transform_indices = @transform_2, window_bounds = array<i64: 1, 16, 1>}, {transform_indices = @transform_3, window_bounds = array<i64: 1, 4, 16, 8>}, {transform_indices = @transform_4, window_bounds = array<i64: 1, 4, 8>}, {pipeline_mode = #tpu.pipeline_mode<synchronous>, transform_indices = @transform_5, window_bounds = array<i64: 1, 8>}, {transform_indices = @transform_6, window_bounds = array<i64: 1, 1, 8>}, {transform_indices = @transform_7, window_bounds = array<i64: 1, 1, 1>}]} {
    %c0 = arith.constant 0 : index
    %c0_0 = arith.constant 0 : index
    %c0_1 = arith.constant 0 : index
    %0 = vector.load %arg2[%c0, %c0_0, %c0_1] : memref<1x32x1xf32, #tpu.memory_space<vmem>>, vector<1x32x1xf32>
    %1 = vector.shape_cast %0 : vector<1x32x1xf32> to vector<32x1xf32>
    %c0_2 = arith.constant 0 : index
    %c0_3 = arith.constant 0 : index
    %c0_4 = arith.constant 0 : index
    %2 = vector.load %arg3[%c0_2, %c0_3, %c0_4] : memref<1x32x8xbf16, #tpu.memory_space<vmem>>, vector<1x32x8xbf16>
    %3 = vector.shape_cast %2 : vector<1x32x8xbf16> to vector<32x8xbf16>
    %4 = arith.extf %3 : vector<32x8xbf16> to vector<32x8xf32>
    %c0_5 = arith.constant 0 : index
    %c0_6 = arith.constant 0 : index
    %c0_7 = arith.constant 0 : index
    %5 = vector.load %arg4[%c0_5, %c0_6, %c0_7] : memref<1x16x1xf32, #tpu.memory_space<vmem>>, vector<1x16x1xf32>
    %6 = vector.shape_cast %5 : vector<1x16x1xf32> to vector<16x1xf32>
    %c0_8 = arith.constant 0 : index
    %c0_9 = arith.constant 0 : index
    %c0_10 = arith.constant 0 : index
    %c0_11 = arith.constant 0 : index
    %7 = vector.load %arg5[%c0_8, %c0_9, %c0_10, %c0_11] : memref<1x4x16x8xbf16, #tpu.memory_space<vmem>>, vector<1x4x16x8xbf16>
    %8 = vector.shape_cast %7 : vector<1x4x16x8xbf16> to vector<4x16x8xbf16>
    %9 = arith.extf %8 : vector<4x16x8xbf16> to vector<4x16x8xf32>
    %c0_12 = arith.constant 0 : index
    %c0_13 = arith.constant 0 : index
    %c0_14 = arith.constant 0 : index
    %10 = vector.load %arg6[%c0_12, %c0_13, %c0_14] : memref<1x4x8xf32, #tpu.memory_space<vmem>>, vector<1x4x8xf32>
    %11 = vector.shape_cast %10 : vector<1x4x8xf32> to vector<4x8xf32>
    %12 = vector.broadcast %1 : vector<32x1xf32> to vector<32x8xf32>
    %13 = arith.mulf %4, %12 : vector<32x8xf32>
    %cst = arith.constant dense<0.000000e+00> : vector<8xf32>
    %14 = vector.multi_reduction <add>, %13, %cst [0] : vector<32x8xf32> to vector<8xf32>
    %15 = vector.shape_cast %14 : vector<8xf32> to vector<1x8xf32>
    %16 = arith.mulf %1, %1 : vector<32x1xf32>
    %cst_15 = arith.constant dense<0.000000e+00> : vector<1xf32>
    %17 = vector.multi_reduction <add>, %16, %cst_15 [0] : vector<32x1xf32> to vector<1xf32>
    %18 = vector.shape_cast %17 : vector<1xf32> to vector<1x1xf32>
    %19 = arith.mulf %4, %4 : vector<32x8xf32>
    %cst_16 = arith.constant dense<0.000000e+00> : vector<8xf32>
    %20 = vector.multi_reduction <add>, %19, %cst_16 [0] : vector<32x8xf32> to vector<8xf32>
    %21 = vector.shape_cast %20 : vector<8xf32> to vector<1x8xf32>
    %22 = vector.broadcast %18 : vector<1x1xf32> to vector<1x8xf32>
    %23 = arith.mulf %22, %21 : vector<1x8xf32>
    %cst_17 = arith.constant 1.000000e-16 : f32
    %24 = vector.broadcast %cst_17 : f32 to vector<1x8xf32>
    %25 = arith.maximumf %23, %24 : vector<1x8xf32>
    %26 = math.rsqrt %25 : vector<1x8xf32>
    %27 = arith.mulf %15, %26 : vector<1x8xf32>
    %28 = vector.shape_cast %6 : vector<16x1xf32> to vector<1x16x1xf32>
    %29 = vector.broadcast %28 : vector<1x16x1xf32> to vector<4x16x8xf32>
    %30 = arith.mulf %9, %29 : vector<4x16x8xf32>
    %cst_18 = arith.constant dense<0.000000e+00> : vector<4x8xf32>
    %31 = vector.multi_reduction <add>, %30, %cst_18 [1] : vector<4x16x8xf32> to vector<4x8xf32>
    %32 = arith.mulf %9, %9 : vector<4x16x8xf32>
    %cst_19 = arith.constant dense<0.000000e+00> : vector<4x8xf32>
    %33 = vector.multi_reduction <add>, %32, %cst_19 [1] : vector<4x16x8xf32> to vector<4x8xf32>
    %34 = arith.mulf %6, %6 : vector<16x1xf32>
    %cst_20 = arith.constant dense<0.000000e+00> : vector<1xf32>
    %35 = vector.multi_reduction <add>, %34, %cst_20 [0] : vector<16x1xf32> to vector<1xf32>
    %36 = vector.shape_cast %35 : vector<1xf32> to vector<1x1xf32>
    %37 = vector.broadcast %36 : vector<1x1xf32> to vector<4x8xf32>
    %38 = arith.mulf %33, %37 : vector<4x8xf32>
    %cst_21 = arith.constant 1.000000e-16 : f32
    %39 = vector.broadcast %cst_21 : f32 to vector<4x8xf32>
    %40 = arith.maximumf %38, %39 : vector<4x8xf32>
    %41 = math.rsqrt %40 : vector<4x8xf32>
    %42 = arith.mulf %31, %41 : vector<4x8xf32>
    %43 = arith.mulf %42, %11 : vector<4x8xf32>
    %cst_22 = arith.constant dense<0xFF800000> : vector<8xf32>
    %44 = vector.multi_reduction <maximumf>, %43, %cst_22 [0] : vector<4x8xf32> to vector<8xf32>
    %45 = vector.shape_cast %44 : vector<8xf32> to vector<1x8xf32>
    %c0_23 = arith.constant 0 : index
    %c0_24 = arith.constant 0 : index
    %46 = vector.load %arg10[%c0_23, %c0_24] : memref<1x8xf32, #tpu.memory_space<vmem>>, vector<1x8xf32>
    tpu.vector_store %arg10[%c0_23, %c0_24], %27 {strides = array<i32>} : memref<1x8xf32, #tpu.memory_space<vmem>>, vector<1x8xf32>,
    %c0_25 = arith.constant 0 : index
    %c0_26 = arith.constant 0 : index
    %47 = vector.load %arg11[%c0_25, %c0_26] : memref<1x8xf32, #tpu.memory_space<vmem>>, vector<1x8xf32>
    tpu.vector_store %arg11[%c0_25, %c0_26], %45 {strides = array<i32>} : memref<1x8xf32, #tpu.memory_space<vmem>>, vector<1x8xf32>,
    %c0_i32 = arith.constant 0 : i32
    %48 = arith.cmpi eq, %arg1, %c0_i32 : i32
    %49 = arith.extui %48 : i1 to i32
    %c0_i32_27 = arith.constant 0 : i32
    %50 = arith.cmpi ne, %49, %c0_i32_27 : i32
    scf.if %50 {
      %c0_28 = arith.constant 0 : index
      %c0_29 = arith.constant 0 : index
      %51 = vector.load %arg10[%c0_28, %c0_29] : memref<1x8xf32, #tpu.memory_space<vmem>>, vector<1x8xf32>
      %c0_30 = arith.constant 0 : index
      %c0_31 = arith.constant 0 : index
      %52 = vector.load %arg11[%c0_30, %c0_31] : memref<1x8xf32, #tpu.memory_space<vmem>>, vector<1x8xf32>
      %c0_32 = arith.constant 0 : index
      %c0_33 = arith.constant 0 : index
      %53 = vector.load %arg7[%c0_32, %c0_33] : memref<1x8xf32, #tpu.memory_space<vmem>>, vector<1x8xf32>
      %54 = arith.mulf %51, %53 : vector<1x8xf32>
      %cst_34 = arith.constant dense<0.000000e+00> : vector<1xf32>
      %55 = vector.multi_reduction <add>, %54, %cst_34 [1] : vector<1x8xf32> to vector<1xf32>
      %56 = vector.shape_cast %55 : vector<1xf32> to vector<1x1xf32>
      %57 = arith.negf %56 : vector<1x1xf32>
      %58 = math.exp %57 : vector<1x1xf32>
      %cst_35 = arith.constant 1.000000e+00 : f32
      %59 = vector.broadcast %cst_35 : f32 to vector<1x1xf32>
      %60 = arith.addf %59, %58 : vector<1x1xf32>
      %61 = arith.divf %59, %60 : vector<1x1xf32>
      %62 = arith.addf %51, %52 : vector<1x8xf32>
      %63 = vector.broadcast %61 : vector<1x1xf32> to vector<1x8xf32>
      %64 = arith.mulf %63, %62 : vector<1x8xf32>
      %cst_36 = arith.constant 5.000000e-01 : f32
      %65 = vector.broadcast %cst_36 : f32 to vector<1x8xf32>
      %66 = arith.mulf %64, %65 : vector<1x8xf32>
      %cst_37 = arith.constant 1.000000e+00 : f32
      %67 = vector.broadcast %cst_37 : f32 to vector<1x1xf32>
      %68 = arith.subf %67, %61 : vector<1x1xf32>
      %69 = vector.broadcast %68 : vector<1x1xf32> to vector<1x8xf32>
      %70 = arith.mulf %69, %51 : vector<1x8xf32>
      %71 = arith.addf %66, %70 : vector<1x8xf32>
      %72 = arith.negf %71 : vector<1x8xf32>
      %73 = math.exp %72 : vector<1x8xf32>
      %cst_38 = arith.constant 1.000000e+00 : f32
      %74 = vector.broadcast %cst_38 : f32 to vector<1x8xf32>
      %75 = arith.addf %74, %73 : vector<1x8xf32>
      %76 = arith.divf %74, %75 : vector<1x8xf32>
      %cst_39 = arith.constant dense<0xFF800000> : vector<1xf32>
      %77 = vector.multi_reduction <maximumf>, %76, %cst_39 [1] : vector<1x8xf32> to vector<1xf32>
      %78 = vector.shape_cast %77 : vector<1xf32> to vector<1x1xf32>
      %79 = vector.broadcast %78 : vector<1x1xf32> to vector<1x8xf32>
      %80 = arith.subf %76, %79 : vector<1x8xf32>
      %81 = math.exp %80 : vector<1x8xf32>
      %cst_40 = arith.constant dense<0.000000e+00> : vector<1xf32>
      %82 = vector.multi_reduction <add>, %81, %cst_40 [1] : vector<1x8xf32> to vector<1xf32>
      %83 = vector.shape_cast %82 : vector<1xf32> to vector<1x1xf32>
      %84 = math.log %83 : vector<1x1xf32>
      %85 = vector.broadcast %84 : vector<1x1xf32> to vector<1x8xf32>
      %86 = arith.subf %80, %85 : vector<1x8xf32>
      %c0_41 = arith.constant 0 : index
      %c0_42 = arith.constant 0 : index
      %c0_43 = arith.constant 0 : index
      %87 = vector.load %arg8[%c0_41, %c0_42, %c0_43] : memref<1x1x8xf32, #tpu.memory_space<vmem>>, vector<1x1x8xf32>
      %88 = vector.shape_cast %87 : vector<1x1x8xf32> to vector<1x8xf32>
      %89 = vector.shape_cast %86 : vector<1x8xf32> to vector<1x1x8xf32>
      tpu.vector_store %arg8[%c0_41, %c0_42, %c0_43], %89 {strides = array<i32>} : memref<1x1x8xf32, #tpu.memory_space<vmem>>, vector<1x1x8xf32>,
      %c0_44 = arith.constant 0 : index
      %c0_45 = arith.constant 0 : index
      %c0_46 = arith.constant 0 : index
      %90 = vector.load %arg9[%c0_44, %c0_45, %c0_46] : memref<1x1x1xf32, #tpu.memory_space<vmem>>, vector<1x1x1xf32>
      %91 = vector.shape_cast %90 : vector<1x1x1xf32> to vector<1x1xf32>
      %92 = vector.shape_cast %56 : vector<1x1xf32> to vector<1x1x1xf32>
      tpu.vector_store %arg9[%c0_44, %c0_45, %c0_46], %92 {strides = array<i32>} : memref<1x1x1xf32, #tpu.memory_space<vmem>>, vector<1x1x1xf32>,
    } else {
    }
    return
  }
  func.func @transform_0(%arg0: i32, %arg1: i32) -> (i32, i32, i32) {
    %c0_i32 = arith.constant 0 : i32
    %c0_i32_0 = arith.constant 0 : i32
    %c0_i32_1 = arith.constant 0 : i32
    return %arg0, %c0_i32, %c0_i32_0 : i32, i32, i32
  }
  func.func @transform_1(%arg0: i32, %arg1: i32) -> (i32, i32, i32) {
    %c0_i32 = arith.constant 0 : i32
    %c0_i32_0 = arith.constant 0 : i32
    return %arg0, %c0_i32, %arg1 : i32, i32, i32
  }
  func.func @transform_2(%arg0: i32, %arg1: i32) -> (i32, i32, i32) {
    %c0_i32 = arith.constant 0 : i32
    %c0_i32_0 = arith.constant 0 : i32
    %c0_i32_1 = arith.constant 0 : i32
    return %arg0, %c0_i32, %c0_i32_0 : i32, i32, i32
  }
  func.func @transform_3(%arg0: i32, %arg1: i32) -> (i32, i32, i32, i32) {
    %c0_i32 = arith.constant 0 : i32
    %c0_i32_0 = arith.constant 0 : i32
    %c0_i32_1 = arith.constant 0 : i32
    return %arg0, %c0_i32, %c0_i32_0, %arg1 : i32, i32, i32, i32
  }
  func.func @transform_4(%arg0: i32, %arg1: i32) -> (i32, i32, i32) {
    %c0_i32 = arith.constant 0 : i32
    %c0_i32_0 = arith.constant 0 : i32
    return %arg0, %c0_i32, %arg1 : i32, i32, i32
  }
  func.func @transform_5(%arg0: i32, %arg1: i32) -> (i32, i32) {
    %c0_i32 = arith.constant 0 : i32
    %c0_i32_0 = arith.constant 0 : i32
    %c0_i32_1 = arith.constant 0 : i32
    return %c0_i32, %c0_i32_0 : i32, i32
  }
  func.func @transform_6(%arg0: i32, %arg1: i32) -> (i32, i32, i32) {
    %c0_i32 = arith.constant 0 : i32
    %c0_i32_0 = arith.constant 0 : i32
    %c0_i32_1 = arith.constant 0 : i32
    return %arg0, %c0_i32, %c0_i32_0 : i32, i32, i32
  }
  func.func @transform_7(%arg0: i32, %arg1: i32) -> (i32, i32, i32) {
    %c0_i32 = arith.constant 0 : i32
    %c0_i32_0 = arith.constant 0 : i32
    %c0_i32_1 = arith.constant 0 : i32
    return %arg0, %c0_i32, %c0_i32_0 : i32, i32, i32
  }
}

</mosaic_0001>

<bundles_post_ra>
// kernel: e2e_entity_linker_forward.2
= control target key start
LH: loop header
LB: loop body
LE: loop exit
PB: predicated region body
PF: predicated region fallthrough
CT: control target
= control target key end

     0   :  { %s1197_s15 = smov 0   ;;  %s1316_s0 = inlined_call_operand.vmem [shape: bf16[2,8,32], index: 0, kind: input, shape index: {}]   ;;  %s1317_s1 = inlined_call_operand.vmem [shape: f32[2,8,1], index: 1, kind: input, shape index: {}]   ;;  %s1318_s2 = inlined_call_operand.vmem [shape: bf16[32,128], index: 2, kind: input, shape index: {}]   ;;  %s1319_s3 = inlined_call_operand.vmem [shape: f32[1,128], index: 3, kind: input, shape index: {}]   ;;  %s1320_s4 = inlined_call_operand.vmem [shape: bf16[64,32], index: 4, kind: input, shape index: {}]   ;;  %s1321_s5 = inlined_call_operand.vmem [shape: f32[1,32], index: 5, kind: input, shape index: {}]   ;;  %s1322_s6 = inlined_call_operand.vmem [shape: f32[1,32], index: 6, kind: input, shape index: {}]   ;;  %s1323_s7 = inlined_call_operand.<no memory space> [shape: f32[1,1], index: 7, kind: input, shape index: {}]   ;;  %s1324_s8 = inlined_call_operand.vmem [shape: bf16[64,32], index: 8, kind: input, shape index: {}]   ;;  %s1325_s9 = inlined_call_operand.vmem [shape: f32[1,32], index: 9, kind: input, shape index: {}]   ;;  %s1326_s10 = inlined_call_operand.vmem [shape: bf16[32,16], index: 10, kind: input, shape index: {}]   ;;  %s1327_s11 = inlined_call_operand.vmem [shape: f32[1,16], index: 11, kind: input, shape index: {}]   ;;  %s1328_s12 = inlined_call_operand.vmem [shape: f32[2,8,1], index: 12, kind: output, shape index: {0}]   ;;  %s1329_s13 = inlined_call_operand.vmem [shape: f32[2,1,16], index: 13, kind: output, shape index: {1}]   ;;  %s1330_s14 = inlined_call_operand.vmem [shape: f32[2,1,32], index: 14, kind: output, shape index: {2}]  }
   0x1   :  { %v20_v0 = vstv %s1323_s7 }
   0x2   :  { %21 = vst [vmem:[#allocation2] sm:$0x1] %v20_v0 }
   0x3 LB: > { %s987_s16 = sadd.s32 4294967295, %s1113_s15   ;;  %p991_p0 = scmp.ge.s32.totalorder %s1113_s15, 1  ;;  %s1113_s15 = sphi %s1197_s15, %s27_s15  }
   0x4   : > { %p427_p1 = scmp.lt.s32.totalorder %s1113_s15, 3 }
   0x6   : > { %p428_p2 = pnand %p991_p0, %p427_p1 }
   0x7   : > { %v1087_v1 = vld [vmem:[%s1318_s2] sm:$0xff] (!%p428_p2)   ;;  %v1115_v2 = vmov (!%p428_p2), 0.0   ;;  %v1088_v3 = vld [vmem:[%s1318_s2 + $0x8] sm:$0xff] (!%p428_p2)   ;;  %vm1116_vm0 = vmmov (!%p428_p2), 0   ;;  %p481_p3 = scmp.lt.s32.totalorder (!%p428_p2), %s987_s16, 1  ;;  %vm525_vm1 = vcmask (!%p428_p2), 261120  }
   0x8   : > { %431 = sbr.rel (%p428_p2) target bundleno = 811 (0x32b), region = 68  ;;  %1034 = vmatprep.subr.bf16.mxu0 (!%p428_p2), %v1115_v2  ;;  %1042 = vmatprep.subr.bf16.mxu1 (!%p428_p2), %v1115_v2  ;;  %v1117_v4 = vmov (!%p428_p2), 0   ;;  %vm680_vm2 = vcmask (!%p428_p2), 7168   ;;  %v1089_v15 = vld [vmem:[%s1320_s4] sm:$0xff] (!%p428_p2)   ;;  %v1090_v16 = vld [vmem:[%s1320_s4 + $0x8] sm:$0xff] (!%p428_p2)   ;;  %v1091_v17 = vld [vmem:[%s1320_s4 + $0x10] sm:$0xff] (!%p428_p2)  }
   0x9   : > { %1035 = vmatpush3.bf16.msra.mxu0 (!%p428_p2), %v1087_v1  ;;  %1038 = vmatprep.mubr.msk.bf16.mxu0 (!%p428_p2), %vm1116_vm0, %v1115_v2  ;;  %v1092_v18 = vld [vmem:[%s1320_s4 + $0x18] sm:$0xff] (!%p428_p2)   ;;  %v1093_v19 = vld [vmem:[%s1324_s8] sm:$0xff] (!%p428_p2)   ;;  %v1094_v20 = vld [vmem:[%s1324_s8 + $0x8] sm:$0xff] (!%p428_p2)   ;;  %vm690_vm3 = vcmask (!%p428_p2), 1048064   ;;  %vm616_vm4 = vcmask (!%p428_p2), 523264   ;;  %s1118_s18 = smov (!%p428_p2), 64  }
   0xa   : > { %1036 = vmatprep.subr.bf16.mxu0 (!%p428_p2), %v1115_v2  ;;  %1086 = vset.pattern.permute.xlu0 (!%p428_p2), %v1117_v4  ;;  %v1095_v21 = vld [vmem:[%s1324_s8 + $0x10] sm:$0xff] (!%p428_p2)   ;;  %v1096_v22 = vld [vmem:[%s1324_s8 + $0x18] sm:$0xff] (!%p428_p2)   ;;  %v995_v23 = vld [vmem:[%s1319_s3] ss:$0 sm:$0xff] (!%p428_p2)  ;;  %vm870_vm5 = vcmask (!%p428_p2), 253952   ;;  %vm847_vm6 = vcmask (!%p428_p2), 122880  }
   0xb   : > { %1050 = vmatprep.mubr.msk.bf16.mxu1 (!%p428_p2), %vm1116_vm0, %v1115_v2  ;;  %1043 = vmatpush3.bf16.msra.mxu1 (!%p428_p2), %v1089_v15  ;;  %v1097_v44 = vld [vmem:[%s1326_s10] sm:$0xff] (!%p428_p2)   ;;  %v1098_v54 = vld [vmem:[%s1326_s10 + $0x8] sm:$0xff] (!%p428_p2)  }
   0xc   : > { %1044 = vmatprep.subr.bf16.mxu1 (!%p428_p2), %v1115_v2  ;;  %v999_v46 = vld [vmem:[%s1321_s5] ss:$0 sm:$0xff] (!%p428_p2) }
   0xd   : > { %1037 = vmatpush3.bf16.msra.mxu0 (!%p428_p2), %v1088_v3  ;;  %v1005_v51 = vld [vmem:[%s1322_s6] ss:$0 sm:$0xff] (!%p428_p2) }
   0xe   : > { %1054 = vmatprep.subr.bf16.mxu0 (!%p428_p2), %v1115_v2  ;;  %v714_v57 = vld [vmem:[%s1325_s9] sm:$0x1] (!%p428_p2) }
   0xf   : > { %s1332_s16 = smov (!%p481_p3, %s987_s16), 1  ;;  %1045 = vmatpush3.bf16.msra.mxu1 %v1090_v16  ;;  %v1006_v1 = vld [vmem:[#allocation2] ss:$0 sm:$0xff] }
  0x10   : > { %s992_s20 = sshll.u32 %s1332_s16, 2  ;;  %s993_s21 = sshll.u32 %s1332_s16, 3  ;;  %1046 = vmatprep.subr.bf16.mxu1 %v1115_v2 }
  0x11   : > { %s484_s24 = scalar_lea.vmem %s1316_s0, %s992_s20  ;;  %s488_s27 = scalar_lea.vmem %s1317_s1, %s993_s21 }
  0x12   : > { %v1231_v5 = vld [vmem:[%s484_s24] sm:$0xf]  ;;  %s492_s17 = scalar_lea.vmem %s1328_s12, %s993_s21  ;;  %s498_s7 = scalar_lea.vmem %s1330_s14, %s1332_s16 }
  0x13   : > { %v501_v6 = vld [vmem:[%s488_s27] sm:$0xff]  ;;  %1039 = vmatmul.mubr.msk.bf16.vlgmr.msra.gmra.mrb[0].mxu0 %vm525_vm1, %v1231_v5  ;;  %1047 = vmatpush3.bf16.msra.mxu1 %v1091_v17  ;;  %s495_s24 = scalar_lea.vmem %s1329_s13, %s1332_s16 }
  0x14   : > { %572 = vperm.xlu0 %1086, %v501_v6   ;;  %v682_v7 = vsel %vm680_vm2, %v501_v6, 0.0  ;;  %1062 = vmatprep.mubr.msk.bf16.mxu0 %vm1116_vm0, %v1115_v2 }
  0x15   : > { %v683_v8 = vrot.slane %v682_v7, 4  ;;  %1048 = vmatprep.subr.bf16.mxu1 %v1115_v2  ;;  %1055 = vmatpush3.bf16.msra.mxu0 %v1093_v19 }
  0x16   : > { %1056 = vmatprep.subr.bf16.mxu0 %v1115_v2 }
  0x17   : > { %v684_v9 = vadd.f32 %v683_v8, %v682_v7  ;;  %1049 = vmatpush3.bf16.msra.mxu1 %v1092_v18 }
  0x18   : > { %1066 = vmatprep.subr.bf16.mxu1 %v1115_v2 }
  0x19   : > { %v685_v10 = vrot.slane %v684_v9, 2  ;;  %1057 = vmatpush3.bf16.msra.mxu0 %v1094_v20 }
  0x1a   : > { %1058 = vmatprep.subr.bf16.mxu0 %v1115_v2 }
  0x1b   : > { %v686_v11 = vadd.f32 %v685_v10, %v684_v9  ;;  %v849_v9 = vunpack.c.l.bf16 %v1231_v5  ;;  %v791_v5 = vld [vmem:[%s1327_s11] sm:$0x1] }
  0x1d   : > { %v687_v12 = vrot.slane %v686_v11, 1  ;;  %1059 = vmatpush3.bf16.msra.mxu0 %v1095_v21 }
  0x1e   : > { %1060 = vmatprep.subr.bf16.mxu0 %v1115_v2 }
  0x1f   : > { %v688_v13 = vadd.f32 %v687_v12, %v686_v11 }
  0x21   : > { %v689_v14 = vmax.f32 %v688_v13, 1.0  ;;  %1061 = vmatpush3.bf16.msra.mxu0 %v1096_v22 }
  0x23   : > { %700 = vperm.xlu0 %1086, %v689_v14  }
  0x93   : > { %v573_v29 = vpop.permute.xlu0 %572 }
  0xa2   : > { %v701_v32 = vpop.permute.xlu0 %700 }
  0xe6   : > { %v563_v24 = vpop.f32.mrb[0].mxu0 }
  0xe7   : > { %v564_v25 = vadd.f32 %v995_v23, %v563_v24  ;;  %v1040_v26 = vpop.f32.mrb[1].mxu0 }
  0xe8   : > { %v566_v27 = vpop.f32.mrb[2].mxu0 }
  0xe9   : > { %1099 = vtanh.f32 %v564_v25  ;;  %v1041_v28 = vpop.f32.mrb[3].mxu0 }
  0xea   : > { %1101 = vrcp.f32 %v701_v32 }
  0xf3   : > { %v1100_v30 = vpop.eup %1099 }
  0xf4   : > { %v575_v31 = vmul.f32 %v1100_v30, %v573_v29  ;;  %v1102_v41 = vpop.eup %1101 }
  0xf6   : > { %v576_v33 = vpack.c.bf16 %v575_v31, %v575_v31  ;;  %v691_v34 = vsel %vm690_vm3, %v575_v31, 0.0 }
  0xf7   : > { %v692_v35 = vrot.slane %v691_v34, 4 }
  0xf8   : > { %1051 = vmatmul.mubr.msk.bf16.vlgmr.msra.gmra.mrb[0].mxu1 %vm616_vm4, %v576_v33 }
  0xf9   : > { %v693_v36 = vadd.f32 %v692_v35, %v691_v34  ;;  %1070 = vmatprep.mubr.msk.bf16.mxu1 %vm1116_vm0, %v1115_v2  ;;  %1067 = vmatpush3.bf16.msra.mxu1 %v1097_v44 }
  0xfa   : > { %1068 = vmatprep.subr.bf16.mxu1 %v1115_v2 }
  0xfb   : > { %v694_v37 = vrot.slane %v693_v36, 2 }
  0xfd   : > { %v695_v38 = vadd.f32 %v694_v37, %v693_v36  ;;  %1069 = vmatpush3.bf16.msra.mxu1 %v1098_v54 }
  0xff   : > { %v696_v39 = vrot.slane %v695_v38, 1 }
 0x101   : > { %v697_v40 = vadd.f32 %v696_v39, %v695_v38 }
 0x103   : > { %v704_v42 = vmul.f32 %v1102_v41, %v697_v40 }
 0x105   : > { %v705_v43 = vpack.c.bf16 %v704_v42, %v704_v42 }
 0x107   : > { %716 = vrot.lane.b32.xlu1 %v705_v43, %s1118_s18 }
 0x179   : > { %v717_v45 = vpop.permute.xlu1 %716 }
 0x17a   : > { %1063 = vmatmul.mubr.msk.bf16.vlgmr.msra.gmra.mrb[4].mxu0 %vm616_vm4, %v717_v45 }
 0x1cb   : > { %v654_v47 = vpop.f32.mrb[0].mxu1 }
 0x1cc   : > { %v655_v48 = vadd.f32 %v999_v46, %v654_v47  ;;  %v1052_v49 = vpop.f32.mrb[1].mxu1 }
 0x1cd   : > { %v657_v50 = vpop.f32.mrb[2].mxu1 }
 0x1ce   : > { %v660_v52 = vmax.f32 %v655_v48, 0.0  ;;  %v1053_v53 = vpop.f32.mrb[3].mxu1 }
 0x1d0   : > { %v668_v55 = vmul.f32 %v1005_v51, %v660_v52 }
 0x1d2   : > { %v669_v56 = vsel %vm525_vm1, %v668_v55, 0.0 }
 0x1d3   : > { %670 = vadd.xlane.f32.xlu1 %v669_v56 }
 0x24d   : > { %v779_v58 = vpop.f32.mrb[4].mxu0 }
 0x24e   : > { %v780_v59 = vadd.f32 %v779_v58, %v714_v57  ;;  %v1064_v60 = vpop.f32.mrb[5].mxu0 }
 0x24f   : > { %v782_v61 = vpop.f32.mrb[6].mxu0 }
 0x250   : > { %v785_v62 = vmax.f32 %v780_v59, 0.0  ;;  %v1065_v63 = vpop.f32.mrb[7].mxu0 }
 0x252   : > { %v786_v0 = vpack.c.bf16 %v785_v62, %v785_v62 }
 0x254   : > { %1071 = vmatmul.mubr.msk.bf16.vlgmr.msra.gmra.mrb[4].mxu1 %vm525_vm1, %v786_v0 }
 0x260   : > { %v671_v2 = vpop.xlane.xlu1 %670 }
 0x261   : > { %v679_v3 = vadd.f32 %v1006_v1, %v671_v2 }
 0x263   : > { %681 = vst.msk [vmem:[%s492_s17] sm:$0xff] %vm680_vm2, %v679_v3  ;;  %v1015_v4 = vmul.f32 -1.442695, %v679_v3 }
 0x265   : > { %1103 = vpow2.f32 %v1015_v4 }
 0x26f   : > { %v1104_v6 = vpop.eup %1103 }
 0x270   : > { %v853_v7 = vadd.f32 1.0, %v1104_v6 }
 0x272   : > { %1105 = vrcp.f32 %v853_v7 }
 0x27c   : > { %v1106_v8 = vpop.eup %1105 }
 0x27d   : > { %858 = vperm.xlu0 %1086, %v1106_v8  }
 0x2fc   : > { %v859_v10 = vpop.permute.xlu0 %858 }
 0x2fd   : > { %v861_v11 = vmul.f32 %v859_v10, %v849_v9 }
 0x2ff   : > { %v862_v12 = vsel %vm525_vm1, %v861_v11, 0.0 }
 0x300   : > { %v863_v13 = vrot.slane %v862_v12, 4 }
 0x302   : > { %v864_v14 = vadd.f32 %v863_v13, %v862_v12 }
 0x304   : > { %v865_v15 = vrot.slane %v864_v14, 2 }
 0x306   : > { %v866_v16 = vadd.f32 %v865_v15, %v864_v14 }
 0x308   : > { %v867_v17 = vrot.slane %v866_v16, 1 }
 0x30a   : > { %v868_v18 = vadd.f32 %v867_v17, %v866_v16 }
 0x30c   : > { %v869_v19 = vmul.f32 0.125, %v868_v18 }
 0x30e   : > { %871 = vst.msk [vmem:[%s498_s7] sm:$0x1] %vm870_vm5, %v869_v19 }
 0x327   : > { %v841_v20 = vpop.f32.mrb[4].mxu1 }
 0x328   : > { %v842_v21 = vadd.f32 %v841_v20, %v791_v5  ;;  %v1072_v22 = vpop.f32.mrb[5].mxu1 }
 0x329   : > { %v844_v23 = vpop.f32.mrb[6].mxu1 }
 0x32a   : > { %848 = vst.msk [vmem:[%s495_s24] sm:$0x1] %vm847_vm6, %v842_v21  ;;  %v1073_v24 = vpop.f32.mrb[7].mxu1 }
 0x32b PF: > { %s27_s15 = sadd.s32 1, %s1113_s15  }
 0x32c   : > { %p24_p4 = scmp.ge.s32.totalorder %s27_s15, 4  }
 0x32e   :  { %26 = sbr.rel (!%p24_p4) target bundleno = 3 (0x3), region = 125 }

// kernel: e2e_entity_linker_forward.3
= control target key start
LH: loop header
LB: loop body
LE: loop exit
PB: predicated region body
PF: predicated region fallthrough
CT: control target
= control target key end

     0   :  { %13 = vsyncpa [#allocation5], 0  ;;  %s1362_s0 = inlined_call_operand.vmem [shape: f32[2,32,1], index: 0, kind: input, shape index: {}]   ;;  %s1363_s1 = inlined_call_operand.vmem [shape: bf16[2,32,8], index: 1, kind: input, shape index: {}]   ;;  %s1364_s2 = inlined_call_operand.vmem [shape: f32[2,16,1], index: 2, kind: input, shape index: {}]   ;;  %s1365_s3 = inlined_call_operand.vmem [shape: bf16[2,4,16,8], index: 3, kind: input, shape index: {}]   ;;  %s1366_s4 = inlined_call_operand.vmem [shape: f32[2,4,8], index: 4, kind: input, shape index: {}]   ;;  %s1367_s5 = inlined_call_operand.vmem [shape: f32[1,8], index: 5, kind: input, shape index: {}]   ;;  %s1368_s6 = inlined_call_operand.hbm [shape: f32[2,1,8], index: 6, kind: output, shape index: {0}]   ;;  %s1369_s7 = inlined_call_operand.vmem [shape: f32[2,1,1], index: 7, kind: output, shape index: {1}]  }
   0x1   :  { %15 = vsyncpa [#allocation5 + $0x1], 0  ;;  %s1133_s24 = smov 0   ;;  %s1135_s25 = smov 0  }
   0x2   :  { %s1137_s26 = smov 0   ;;  %s1139_s27 = smov 0  }
   0x3   :  { %s1141_s28 = smov 0   ;;  %s1143_s29 = smov 0  }
   0x4 LB: > { %s880_s30 = sadd.s32 4294967295, %s1089_s29   ;;  %s881_s8 = sadd.s32 4294967294, %s1089_s29   ;;  %s1089_s29 = sphi %s1143_s29, %s21_s29   ;;  %s1085_s28 = sphi %s1141_s28, %s1376_s28   ;;  %s1081_s27 = sphi %s1139_s27, %s1375_s27   ;;  %s1077_s26 = sphi %s1137_s26, %s1374_s26   ;;  %s1073_s25 = sphi %s1135_s25, %s1373_s25   ;;  %s1069_s24 = sphi %s1133_s24, %s1372_s24  }
   0x5   : > { %s33_s9 = sadd.s32 1, %s1085_s28  ;;  %s197_s10 = sadd.s32 1, %s1077_s26 }
   0x6   : > { %p35_p0 = scmp.ge.s32.totalorder %s33_s9, 2  ;;  %p207_p1 = scmp.ne.s32.totalorder %s1077_s26, %s1073_s25 }
   0x7   : > { %p208_p2 = scmp.eq.s32.totalorder %s880_s30, 1  ;;  %p213_p3 = scmp.ne.s32.totalorder %s1073_s25, %s1069_s24 }
   0x8   : > { %s1378_s9 = smov (%p35_p0, %s33_s9), 0  ;;  %p214_p5 = scmp.eq.s32.totalorder %s881_s8, 1 }
   0x9   : > { %p1173_p4 = por %p208_p2, %p207_p1  ;;  %s194_s12 = ssub.s32 %s1085_s28, %s1378_s9 }
   0xa   : > { %p884_p6 = scmp.ge.s32.totalorder %s1089_s29, 1  ;;  %p195_p7 = scmp.eq.s32.totalorder %s194_s12, 0 }
   0xb   : > { %p1180_p8 = por %p214_p5, %p213_p3  ;;  %p309_p9 = scmp.lt.s32.totalorder %s1089_s29, 3 }
   0xc   : > { %s1186_s14 = scalar_select %p195_p7, %s1077_s26, %s197_s10  }
   0xd   : > { %p310_p10 = pnand %p884_p6, %p309_p9 }
   0xe   : > { %p371_p11 = scmp.lt.s32.totalorder (!%p310_p10), %s1081_s27, 1  ;;  %v1091_v0 = vmov (!%p310_p10), 0   ;;  %vm480_vm0 = vcmask (!%p310_p10), 7168   ;;  %vm462_vm1 = vcmask (!%p310_p10), 64512   ;;  %vm662_vm2 = vcmask (!%p310_p10), 57344   ;;  %s896_s12 = sshll.u32 (!%p310_p10), %s1081_s27, 4 }
   0xf   : > { %313 = sbr.rel (%p310_p10) target bundleno = 735 (0x2df), region = 44  ;;  %987 = vset.pattern.permute.xlu0 (!%p310_p10), %v1091_v0  ;;  %988 = vset.pattern.permute.xlu1 (!%p310_p10), %v1091_v0  ;;  %vm714_vm3 = vcmask (!%p310_p10), 0  }
  0x16   : > { %s1190_s15 = scalar_select %p371_p11, %s1081_s27, 1 }
  0x17   : > { %s1092_s27 = smov [#allocation4]  }
  0x18   : > { %s899_s16 = sshll.u32 %s1190_s15, 5  ;;  %s900_s20 = sshll.u32 %s1190_s15, 4 }
  0x19   : > { %s375_s19 = scalar_lea.vmem %s1362_s0, %s899_s16  ;;  %s388_s23 = scalar_lea.vmem %s1364_s2, %s900_s20 }
  0x1a   : > { %v407_v1 = vld [vmem:[%s375_s19] sm:$0xff]  ;;  %v409_v2 = vld [vmem:[%s375_s19 + $0x10] sm:$0xff]  ;;  %v408_v3 = vld [vmem:[%s375_s19 + $0x8] sm:$0xff]  ;;  %s383_s10 = scalar_lea.vmem %s1363_s1, %s900_s20  ;;  %s396_s18 = scalar_lea.vmem %s1365_s3, %s899_s16 }
  0x1b   : > { %440 = vperm.xlu0 %987, %v407_v1   ;;  %v476_v4 = vmul.f32 %v407_v1, %v407_v1  ;;  %450 = vperm.xlu1 %988, %v409_v2   ;;  %v478_v5 = vmul.f32 %v409_v2, %v409_v2  ;;  %v477_v6 = vmul.f32 %v408_v3, %v408_v3  ;;  %v410_v7 = vld [vmem:[%s375_s19 + $0x18] sm:$0xff]  ;;  %v419_v9 = vld [vmem:[%s388_s23] sm:$0xff]  ;;  %v420_v10 = vld [vmem:[%s388_s23 + $0x8] sm:$0xff]  ;;  %s893_s16 = sshll.u32 %s1190_s15, 2  ;;  %s1314_s20 = scalar_lea.hbm %s1368_s6, %s896_s12 }
  0x1c   : > { %v479_v8 = vmul.f32 %v410_v7, %v410_v7  ;;  %v618_v14 = vmul.f32 %v419_v9, %v419_v9  ;;  %v619_v16 = vmul.f32 %v420_v10, %v420_v10  ;;  %v904_v35 = vld [vmem:[%s383_s10] sm:$0xff]   ;;  %v927_v37 = vld [vmem:[%s383_s10 + $0x8] sm:$0xff]   ;;  %v929_v45 = vld [vmem:[%s396_s18 + $0x10] sm:$0xff]   ;;  %s403_s21 = scalar_lea.vmem %s1366_s4, %s893_s16  ;;  %s406_s10 = scalar_lea.vmem %s1369_s7, %s1190_s15 }
  0x1d   : > { %v481_v11 = vsel %vm480_vm0, %v476_v4, 0.0  ;;  %v484_v12 = vsel %vm480_vm0, %v478_v5, 0.0  ;;  %v482_v13 = vsel %vm480_vm0, %v477_v6, 0.0  ;;  %v905_v36 = vunpack.c.l.bf16 %v904_v35  ;;  %v912_v42 = vld [vmem:[%s396_s18] sm:$0xff]   ;;  %v928_v43 = vld [vmem:[%s396_s18 + $0x8] sm:$0xff]   ;;  %v930_v53 = vld [vmem:[%s396_s18 + $0x18] sm:$0xff]  }
  0x1e   : > { %v483_v15 = vadd.f32 %v482_v13, %v481_v11  ;;  %v486_v17 = vsel %vm480_vm0, %v479_v8, 0.0  ;;  %v620_v18 = vsel %vm480_vm0, %v618_v14, 0.0  ;;  %v621_v20 = vsel %vm480_vm0, %v619_v16, 0.0  ;;  %s364_s15 = sand.u32 1, %s1073_s25   ;;  %s1015_s23 = sshll.u32 %s1092_s27, 4  ;;  %s1016_s23 = int_to_ptr.vmem [resolvable:$false] %s1015_s23 }
  0x1f   : > { %445 = vperm.xlu0 %987, %v408_v3   ;;  %455 = vperm.xlu1 %988, %v410_v7   ;;  %v622_v21 = vadd.f32 %v621_v20, %v620_v18  ;;  %v1215_v38 = vunpack.c.h.bf16 %v904_v35  ;;  %v909_v39 = vunpack.c.l.bf16 %v927_v37  ;;  %v494_v40 = vmul.f32 %v905_v36, %v905_v36  ;;  %s365_s17 = scalar_lea.vmem [#allocation4], %s364_s15  ;;  %s1017_s30 = scalar_lea.vmem %s1016_s23, 32 }
  0x20   : > { %v485_v19 = vadd.f32 %v484_v12, %v483_v15  ;;  %v1226_v48 = vunpack.c.l.bf16 %v912_v42  ;;  %v1228_v49 = vunpack.c.h.bf16 %v912_v42  ;;  %v910_v50 = vunpack.c.h.bf16 %v927_v37  ;;  %s732_s18 = sshll.u32 %s365_s17, 4  ;;  %s1316_s18 = int_to_ptr.vmem [resolvable:$true] %s732_s18 }
  0x21   : > { %v623_v23 = vrot.slane %v622_v21, 4  ;;  %v495_v41 = vmul.f32 %v1215_v38, %v1215_v38  ;;  %v496_v44 = vmul.f32 %v909_v39, %v909_v39  ;;  %v498_v46 = vsel %vm462_vm1, %v494_v40, 0.0  ;;  %s1011_s22 = scalar_lea.vmem %s1316_s18, 16  ;;  %p1018_p1 = scmp.lt.s32.totalorder %s1316_s18, %s1016_s23 }
  0x22   : > { %v487_v22 = vadd.f32 %v486_v17, %v485_v19  ;;  %v1230_v51 = vunpack.c.l.bf16 %v928_v43  ;;  %v1232_v52 = vunpack.c.h.bf16 %v928_v43  ;;  %v1234_v54 = vunpack.c.l.bf16 %v929_v45  ;;  %p1012_p12 = scmp.ne.s32.totalorder %s1316_s18, %s1011_s22  ;;  %p1019_p2 = scmp.lt.s32.totalorder %s1017_s30, %s1011_s22 }
  0x23   : > { %522 = vperm.xlu1 %988, %v419_v9   ;;  %v624_v25 = vadd.f32 %v623_v23, %v622_v21  ;;  %v499_v47 = vsel %vm462_vm1, %v495_v41, 0.0  ;;  %v1236_v55 = vunpack.c.h.bf16 %v929_v45  ;;  %v501_v56 = vsel %vm462_vm1, %v496_v44, 0.0 }
  0x24   : > { %v488_v24 = vrot.slane %v487_v22, 4  ;;  %v500_v57 = vadd.f32 %v499_v47, %v498_v46  ;;  %v1239_v58 = vunpack.c.l.bf16 %v930_v53  ;;  %v1241_v59 = vunpack.c.h.bf16 %v930_v53  ;;  %p1013_p13 = pnand %p1012_p12, %p1173_p4  ;;  %p1020_p3 = por %p1019_p2, %p1018_p1 }
  0x25   : > { %v625_v27 = vrot.slane %v624_v25, 2  ;;  %v574_v60 = vmul.f32 %v1226_v48, %v1226_v48  ;;  %v575_v61 = vmul.f32 %v1228_v49, %v1228_v49  ;;  %v497_v62 = vmul.f32 %v910_v50, %v910_v50 }
  0x26   : > { %v489_v26 = vadd.f32 %v488_v24, %v487_v22  ;;  %v576_v63 = vmul.f32 %v1230_v51, %v1230_v51  ;;  %v577_v0 = vmul.f32 %v1232_v52, %v1232_v52  ;;  %v578_v1 = vmul.f32 %v1234_v54, %v1234_v54  ;;  %p1014_p0 = pneg %p1013_p13 }
  0x27   : > { %v626_v29 = vadd.f32 %v625_v27, %v624_v25  ;;  %v579_v2 = vmul.f32 %v1236_v55, %v1236_v55  ;;  %v502_v3 = vadd.f32 %v501_v56, %v500_v57  ;;  %v580_v4 = vmul.f32 %v1239_v58, %v1239_v58 }
  0x28   : > { %v490_v28 = vrot.slane %v489_v26, 2  ;;  %v581_v5 = vmul.f32 %v1241_v59, %v1241_v59  ;;  %v582_v6 = vsel %vm462_vm1, %v574_v60, 0.0  ;;  %v583_v7 = vsel %vm462_vm1, %v575_v61, 0.0  ;;  %p1021_p5 = pnand %p1020_p3, %p1014_p0 }
  0x29   : > { %v627_v31 = vrot.slane %v626_v29, 1  ;;  %v503_v8 = vsel %vm462_vm1, %v497_v62, 0.0  ;;  %v591_v9 = vsel %vm462_vm1, %v576_v63, 0.0  ;;  %v600_v11 = vsel %vm462_vm1, %v578_v1, 0.0 }
  0x2a   : > { %v491_v30 = vadd.f32 %v490_v28, %v489_v26  ;;  %v601_v12 = vsel %vm462_vm1, %v579_v2, 0.0  ;;  %v584_v13 = vadd.f32 %v583_v7, %v582_v6  ;;  %v504_v14 = vadd.f32 %v503_v8, %v502_v3 }
  0x2b   : > { %v628_v33 = vadd.f32 %v627_v31, %v626_v29  ;;  %v609_v16 = vsel %vm462_vm1, %v580_v4, 0.0  ;;  %v610_v17 = vsel %vm462_vm1, %v581_v5, 0.0  ;;  %v602_v18 = vadd.f32 %v601_v12, %v600_v11 }
  0x2c   : > { %v492_v32 = vrot.slane %v491_v30, 1  ;;  %v611_v19 = vadd.f32 %v610_v17, %v609_v16  ;;  %v585_v20 = vrot.slane %v584_v13, 4  ;;  %v505_v22 = vrot.slane %v504_v14, 4 }
  0x2d   : > { %631 = vperm.xlu1 %988, %v628_v33   ;;  %v603_v23 = vrot.slane %v602_v18, 4 }
  0x2e   : > { %v493_v34 = vadd.f32 %v492_v32, %v491_v30  ;;  %v586_v27 = vadd.f32 %v585_v20, %v584_v13  ;;  %v612_v28 = vrot.slane %v611_v19, 4  ;;  %v506_v30 = vadd.f32 %v505_v22, %v504_v14 }
  0x2f   : > { %v604_v32 = vadd.f32 %v603_v23, %v602_v18 }
  0x30   : > { %513 = vperm.xlu0 %987, %v493_v34   ;;  %v587_v40 = vrot.slane %v586_v27, 2  ;;  %v613_v41 = vadd.f32 %v612_v28, %v611_v19  ;;  %v507_v44 = vrot.slane %v506_v30, 2 }
  0x31   : > { %v605_v46 = vrot.slane %v604_v32, 2 }
  0x32   : > { %v588_v53 = vadd.f32 %v587_v40, %v586_v27  ;;  %v508_v61 = vadd.f32 %v507_v44, %v506_v30 }
  0x33   : > { %v606_v62 = vadd.f32 %v605_v46, %v604_v32 }
  0x34   : > { %527 = vperm.xlu0 %987, %v420_v10   ;;  %v592_v10 = vsel %vm462_vm1, %v577_v0, 0.0  ;;  %v589_v63 = vrot.slane %v588_v53, 1  ;;  %v509_v2 = vrot.slane %v508_v61, 1 }
  0x35   : > { %v593_v15 = vadd.f32 %v592_v10, %v591_v9  ;;  %v607_v3 = vrot.slane %v606_v62, 1 }
  0x36   : > { %v590_v5 = vadd.f32 %v589_v63, %v588_v53  ;;  %v510_v8 = vadd.f32 %v509_v2, %v508_v61  ;;  %v437_v61 = vld [vmem:[%s403_s21] sm:$0xf]  ;;  %s717_s21 = scalar_lea.sflag [#allocation5], %s364_s15 }
  0x37   : > { %v594_v21 = vrot.slane %v593_v15, 4  ;;  %v608_v9 = vadd.f32 %v607_v3, %v606_v62 }
  0x39   : > { %v595_v29 = vadd.f32 %v594_v21, %v593_v15 }
  0x3b   : > { %v596_v43 = vrot.slane %v595_v29, 2 }
  0x3d   : > { %v597_v60 = vadd.f32 %v596_v43, %v595_v29 }
  0x3f   : > { %v598_v1 = vrot.slane %v597_v60, 1 }
  0x41   : > { %v599_v7 = vadd.f32 %v598_v1, %v597_v60 }
  0x9a   : > { %v441_v24 = vpop.permute.xlu0 %440  ;;  %v451_v25 = vpop.permute.xlu1 %450 }
  0x9b   : > { %v458_v26 = vmul.f32 %v905_v36, %v441_v24  ;;  %v460_v31 = vmul.f32 %v909_v39, %v451_v25  ;;  %v614_v39 = vrot.slane %v613_v41, 2 }
  0x9d   : > { %v463_v35 = vsel %vm462_vm1, %v458_v26, 0.0  ;;  %v466_v45 = vsel %vm462_vm1, %v460_v31, 0.0  ;;  %v615_v0 = vadd.f32 %v614_v39, %v613_v41 }
  0x9e   : > { %v446_v33 = vpop.permute.xlu0 %445  ;;  %v456_v34 = vpop.permute.xlu1 %455 }
  0x9f   : > { %v459_v37 = vmul.f32 %v1215_v38, %v446_v33  ;;  %v461_v42 = vmul.f32 %v910_v50, %v456_v34  ;;  %v616_v6 = vrot.slane %v615_v0, 1 }
  0xa1   : > { %v464_v36 = vsel %vm462_vm1, %v459_v37, 0.0  ;;  %v468_v57 = vsel %vm462_vm1, %v461_v42, 0.0  ;;  %v617_v14 = vadd.f32 %v616_v6, %v615_v0 }
  0xa2   : > { %v465_v47 = vadd.f32 %v464_v36, %v463_v35  ;;  %v523_v50 = vpop.permute.xlu1 %522 }
  0xa3   : > { %v530_v10 = vmul.f32 %v1226_v48, %v523_v50  ;;  %v532_v13 = vmul.f32 %v1230_v51, %v523_v50  ;;  %v534_v19 = vmul.f32 %v1234_v54, %v523_v50  ;;  %v536_v20 = vmul.f32 %v1239_v58, %v523_v50 }
  0xa4   : > { %v467_v56 = vadd.f32 %v466_v45, %v465_v47 }
  0xa5   : > { %v538_v22 = vsel %vm462_vm1, %v530_v10, 0.0  ;;  %v547_v48 = vsel %vm462_vm1, %v532_v13, 0.0  ;;  %v556_v54 = vsel %vm462_vm1, %v534_v19, 0.0  ;;  %v565_v58 = vsel %vm462_vm1, %v536_v20, 0.0 }
  0xa6   : > { %v469_v38 = vadd.f32 %v468_v57, %v467_v56  ;;  %v652_v10 = vrot.slane %v437_v61, 2 }
  0xa8   : > { %v470_v4 = vrot.slane %v469_v38, 4 }
  0xaa   : > { %v471_v12 = vadd.f32 %v470_v4, %v469_v38 }
  0xac   : > { %v632_v11 = vpop.permute.xlu1 %631  ;;  %v472_v24 = vrot.slane %v471_v12, 2 }
  0xad   : > { %v634_v15 = vmul.f32 %v632_v11, %v590_v5  ;;  %v635_v17 = vmul.f32 %v632_v11, %v599_v7  ;;  %v636_v21 = vmul.f32 %v632_v11, %v608_v9  ;;  %v637_v25 = vmul.f32 %v632_v11, %v617_v14 }
  0xae   : > { %v651_v9 = vrot.slane %v437_v61, 1 }
  0xaf   : > { %v514_v16 = vpop.permute.xlu0 %513  ;;  %v638_v23 = vmax.f32 %v634_v15, 1e-16  ;;  %v639_v51 = vmax.f32 %v635_v17, 1e-16  ;;  %v640_v31 = vmax.f32 %v636_v21, 1e-16 }
  0xb0   : > { %v516_v18 = vmul.f32 %v514_v16, %v510_v8  ;;  %v641_v40 = vmax.f32 %v637_v25, 1e-16  ;;  %v653_v16 = vrot.slane %v437_v61, 3 }
  0xb1   : > { %989 = vrsqrt.f32 %v638_v23 }
  0xb2   : > { %v517_v26 = vmax.f32 %v516_v18, 1e-16 }
  0xb3   : > { %v528_v27 = vpop.permute.xlu0 %527 }
  0xb4   : > { %v531_v28 = vmul.f32 %v1228_v49, %v528_v27  ;;  %v533_v29 = vmul.f32 %v1232_v52, %v528_v27  ;;  %v535_v30 = vmul.f32 %v1236_v55, %v528_v27  ;;  %v537_v32 = vmul.f32 %v1241_v59, %v528_v27 }
  0xb5   : > { %991 = vrsqrt.f32 %v517_v26  ;;  %v473_v55 = vadd.f32 %v472_v24, %v471_v12 }
  0xb6   : > { %v539_v33 = vsel %vm462_vm1, %v531_v28, 0.0  ;;  %v548_v34 = vsel %vm462_vm1, %v533_v29, 0.0  ;;  %v557_v35 = vsel %vm462_vm1, %v535_v30, 0.0  ;;  %993 = vrsqrt.f32 %v639_v51  ;;  %v678_v28 = vld [vmem:[%s1367_s5] sm:$0x1] }
  0xb7   : > { %v540_v49 = vadd.f32 %v539_v33, %v538_v22  ;;  %v549_v52 = vadd.f32 %v548_v34, %v547_v48  ;;  %v558_v37 = vadd.f32 %v557_v35, %v556_v54  ;;  %v566_v41 = vsel %vm462_vm1, %v537_v32, 0.0 }
  0xb8   : > { %v567_v44 = vadd.f32 %v566_v41, %v565_v58  ;;  %995 = vrsqrt.f32 %v640_v31  ;;  %v474_v53 = vrot.slane %v473_v55, 1 }
  0xb9   : > { %v541_v42 = vrot.slane %v540_v49, 4  ;;  %v550_v43 = vrot.slane %v549_v52, 4  ;;  %v559_v59 = vrot.slane %v558_v37, 4  ;;  %997 = vrsqrt.f32 %v641_v40 }
  0xba   : > { %v568_v47 = vrot.slane %v567_v44, 4  ;;  %v475_v1 = vadd.f32 %v474_v53, %v473_v55 }
  0xbb   : > { %v542_v45 = vadd.f32 %v541_v42, %v540_v49  ;;  %v551_v36 = vadd.f32 %v550_v43, %v549_v52  ;;  %v560_v46 = vadd.f32 %v559_v59, %v558_v37  ;;  %v990_v50 = vpop.eup %989 }
  0xbc   : > { %v569_v60 = vadd.f32 %v568_v47, %v567_v44 }
  0xbd   : > { %v543_v39 = vrot.slane %v542_v45, 2  ;;  %v552_v56 = vrot.slane %v551_v36, 2  ;;  %v561_v57 = vrot.slane %v560_v46, 2 }
  0xbe   : > { %v570_v0 = vrot.slane %v569_v60, 2 }
  0xbf   : > { %v544_v62 = vadd.f32 %v543_v39, %v542_v45  ;;  %v553_v38 = vadd.f32 %v552_v56, %v551_v36  ;;  %v562_v63 = vadd.f32 %v561_v57, %v560_v46  ;;  %v992_v2 = vpop.eup %991 }
  0xc0   : > { %v571_v6 = vadd.f32 %v570_v0, %v569_v60  ;;  %v994_v7 = vpop.eup %993  ;;  %v519_v8 = vmul.f32 %v992_v2, %v475_v1 }
  0xc1   : > { %v545_v3 = vrot.slane %v544_v62, 1  ;;  %v554_v4 = vrot.slane %v553_v38, 1  ;;  %v563_v5 = vrot.slane %v562_v63, 1 }
  0xc2   : > { %v572_v14 = vrot.slane %v571_v6, 1  ;;  %v996_v15 = vpop.eup %995  ;;  %670 = vst.msk [vmem:[#allocation2] sm:$0x1] %vm662_vm2, %v519_v8 }
  0xc3   : > { %v546_v11 = vadd.f32 %v545_v3, %v544_v62  ;;  %v555_v12 = vadd.f32 %v554_v4, %v553_v38  ;;  %v564_v13 = vadd.f32 %v563_v5, %v562_v63  ;;  %v998_v21 = vpop.eup %997 }
  0xc4   : > { %v573_v17 = vadd.f32 %v572_v14, %v571_v6 }
  0xc5   : > { %v646_v18 = vmul.f32 %v990_v50, %v546_v11  ;;  %v647_v19 = vmul.f32 %v994_v7, %v555_v12  ;;  %v648_v20 = vmul.f32 %v996_v15, %v564_v13 }
  0xc6   : > { %v649_v22 = vmul.f32 %v998_v21, %v573_v17 }
  0xc7   : > { %v658_v23 = vmul.f32 %v646_v18, %v437_v61  ;;  %v659_v24 = vmul.f32 %v651_v9, %v647_v19  ;;  %v660_v48 = vmul.f32 %v652_v10, %v648_v20 }
  0xc8   : > { %v661_v25 = vmul.f32 %v653_v16, %v649_v22 }
  0xc9   : > { %v663_v26 = vsel %vm662_vm2, %v658_v23, -inf  ;;  %v664_v27 = vsel %vm662_vm2, %v659_v24, -inf  ;;  %v665_v51 = vsel %vm662_vm2, %v660_v48, -inf  ;;  %v676_v54 = vld [vmem:[#allocation2] sm:$0x1] }
  0xca   : > { %v667_v29 = vmax.f32 %v663_v26, %v664_v27  ;;  %v666_v30 = vsel %vm662_vm2, %v661_v25, -inf  ;;  %v679_v31 = vmul.f32 %v678_v28, %v676_v54 }
  0xcb   : > { %v668_v58 = vmax.f32 %v665_v51, %v666_v30 }
  0xcc   : > { %v680_v33 = vsel %vm662_vm2, %v679_v31, 0.0 }
  0xcd   : > { %v669_v32 = vmax.f32 %v667_v29, %v668_v58  ;;  %681 = vadd.xlane.f32.xlu0 %v680_v33 }
  0xcf   : > { %671 = vst.msk [vmem:[#allocation3] sm:$0x1] %vm662_vm2, %v669_v32 }
  0xd6   : > { %v677_v37 = vld [vmem:[#allocation3] sm:$0x1] }
  0xd7   : > { %v689_v55 = vadd.f32 %v677_v37, %v676_v54 }
 0x15a   : > { %v682_v34 = vpop.xlane.xlu0 %681 }
 0x15b   : > { %v894_v35 = vmul.f32 -1.442695, %v682_v34  ;;  %715 = vst.msk [vmem:[%s406_s10] sm:$0x1] %vm714_vm3, %v682_v34 }
 0x15d   : > { %999 = vpow2.f32 %v894_v35 }
 0x167   : > { %v1000_v49 = vpop.eup %999 }
 0x168   : > { %v686_v52 = vadd.f32 1.0, %v1000_v49 }
 0x16a   : > { %1001 = vrcp.f32 %v686_v52 }
 0x174   : > { %v1002_v40 = vpop.eup %1001 }
 0x175   : > { %v690_v41 = vmul.f32 %v1002_v40, %v689_v55  ;;  %v692_v42 = vsub.f32 1.0, %v1002_v40 }
 0x177   : > { %v691_v43 = vmul.f32 0.5, %v690_v41  ;;  %v693_v59 = vmul.f32 %v692_v42, %v676_v54 }
 0x179   : > { %v694_v44 = vadd.f32 %v693_v59, %v691_v43 }
 0x17b   : > { %v895_v45 = vmul.f32 -1.442695, %v694_v44 }
 0x17d   : > { %1003 = vpow2.f32 %v895_v45 }
 0x187   : > { %v1004_v36 = vpop.eup %1003 }
 0x188   : > { %v698_v46 = vadd.f32 1.0, %v1004_v36 }
 0x18a   : > { %1005 = vrcp.f32 %v698_v46 }
 0x194   : > { %v1006_v47 = vpop.eup %1005 }
 0x195   : > { %v701_v53 = vsel %vm662_vm2, %v1006_v47, -inf }
 0x196   : > { %702 = vmax.xlane.f32.xlu1 %v701_v53 }
 0x223   : > { %v703_v39 = vpop.xlane.xlu1 %702 }
 0x224   : > { %v704_v56 = vsub.f32 %v1006_v47, %v703_v39 }
 0x226   : > { %v705_v57 = vmul.f32 1.442695, %v704_v56 }
 0x228   : > { %1007 = vpow2.f32 %v705_v57 }
 0x232   : > { %v1008_v60 = vpop.eup %1007 }
 0x233   : > { %v707_v61 = vsel %vm662_vm2, %v1008_v60, 0.0 }
 0x234   : > { %708 = vadd.xlane.f32.xlu0 %v707_v61 }
 0x2c1   : > { %v709_v62 = vpop.xlane.xlu0 %708 }
 0x2c2   : > { %1009 = vlog2.f32 %v709_v62 }
 0x2cc   : > { %v1010_v38 = vpop.eup %1009 }
 0x2cd   : > { %v711_v63 = vmul.f32 0.6931472, %v1010_v38 }
 0x2cf   : > { %v712_v0 = vsub.f32 %v704_v56, %v711_v63 }
 0x2d1   : > { %713 = vst.msk [vmem:[%s365_s17] sm:$0x1] %vm662_vm2, %v712_v0 }
 0x2d2   : > { %1024 = shalt.err (!%p1021_p5)
}
 0x2d3   : > { %s1025_s8 = scalar_lea.hbm %s1314_s20, 16  ;;  %s1029_s12 = scalar_lea.hbm %s1368_s6, 32 }
 0x2d4   : > { %p1026_p6 = scmp.ne.s32.totalorder %s1314_s20, %s1025_s8  ;;  %p1030_p10 = scmp.lt.u32.totalorder %s1314_s20, %s1368_s6 }
 0x2d5   : > { %p1031_p11 = scmp.lt.u32.totalorder %s1029_s12, %s1025_s8  ;;  %p1033_p13 = scmp.lt.u32.totalorder %s1025_s8, %s1314_s20 }
 0x2d6   : > { %p1027_p7 = pnand %p1026_p6, %p1173_p4 }
 0x2d7   : > { %p1032_p12 = por %p1031_p11, %p1030_p10 }
 0x2d8   : > { %p1028_p9 = pneg %p1027_p7 }
 0x2d9   : > { %p1034_p0 = por %p1033_p13, %p1032_p12 }
 0x2db   : > { %p1035_p1 = pnand %p1034_p0, %p1028_p9 }
 0x2dd   : > { %1038 = shalt.err (!%p1035_p1)
}
 0x2de   : > { %931 = dma.vmem_to_hbm [thread:$0]  (%p1173_p4), %s1316_s18, 16, %s1314_s20, %s717_s21  }
 0x2df PF: > { %p937_p2 = scmp.ge.s32.totalorder %s1089_s29, 2  ;;  %s747_s19 = sand.u32 1, %s1069_s24  }
 0x2e0   : > { %s748_s22 = scalar_lea.sflag [#allocation5], %s747_s19 }
 0x2e1   : > { %p934_p3 = pnand %p937_p2, %p1180_p8 }
 0x2e3   : > { %1064 = dma.done.wait (!%p934_p3), %s748_s22, 16  }
 0x2e4   : > { %1066 = vsyncadd (!%p934_p3), %s748_s22, 4294967280  ;;  %s21_s29 = sadd.s32 1, %s1089_s29   ;;  %s1372_s24 = smov %s1073_s25 }
 0x2e5   : > { %p18_p5 = scmp.ge.s32.totalorder %s21_s29, 4   ;;  %s1373_s25 = smov %s1077_s26 }
 0x2e6   : > { %s1374_s26 = smov %s1186_s14  ;;  %s1375_s27 = smov %s1085_s28 }
 0x2e7   : > { %s1376_s28 = smov %s1378_s9  ;;  %20 = sbr.rel (!%p18_p5) target bundleno = 4 (0x4), region = 107 }
 0x2ee   :  { %758 = vsyncpa [#allocation5], 1 }
 0x2ef   :  { %760 = vsyncpa [#allocation5 + $0x1], 1 }

</bundles_post_ra>
